<compile_context>
chip_gen: v6e
topology: v6e:2x2x1
jax: 0.10.0
libtpu: 0.0.40
codegen_flags: <defaults>
</compile_context>

<pallas_src>
import jax
import jax.numpy as jnp
from jax.experimental import pallas as pl
from jax.experimental.pallas import tpu as pltpu

# ---- problem sizes (from the module spec) ----
L = 16          # input_length
C1 = 32         # conv1 out channels (PyTorch)
C2 = 64         # conv2 out channels
K1 = 5          # conv1 kernel size (padding=2)
K2 = 3          # conv2 kernel size (padding=1)
H = 64          # fc1 hidden size

# ---- kernel layout constants ----
KP = 8          # conv1 taps padded 5 -> 8 (extra taps have zero weight)
CP = 64         # conv1 channels padded 32 -> 64 (lane width == C2 == H)

# Packed-parameter slab row offsets (all multiples of 8 -> aligned slices).
OFF_W1 = 0                        # (KP, CP)
OFF_B1 = OFF_W1 + KP              # (1, CP)  padded to 8 rows
OFF_W2 = OFF_B1 + 8               # (K2*CP, C2), row = k*CP + c  (fused conv2 weight)
OFF_B2 = OFF_W2 + K2 * CP         # (1, C2)  padded to 8 rows
OFF_FC1W = OFF_B2 + 8             # (L*C2, H), row = l*C2 + c
OFF_FC1B = OFF_FC1W + L * C2      # (1, H)   padded to 8 rows
OFF_FC2W = OFF_FC1B + 8           # (1, H)   padded to 8 rows (rows 1..7 zero)
OFF_FC2B = OFF_FC2W + 8           # (1, C2)  bias at [., 0], padded to 8 rows
SLAB_ROWS = OFF_FC2B + 8          # = 1264 rows x 64 lanes x 4 B ~= 316 KiB


def _make_kernel(b_tile):
    """Build the kernel for a given (static) batch tile size."""
    r = b_tile * L  # activation rows per grid step, row = l*b_tile + b_local

    def kernel(patch_ref, slab_ref, out_ref, x2_ref, y2_ref, hin_ref):
        # patch_ref : (r, KP)        im2col rows of the input
        # slab_ref  : (SLAB_ROWS,64) packed parameters (resident across the grid)
        # out_ref   : (1, 1, b_tile) lane-dense sigmoid outputs for this tile
        # x2_ref    : (r, K2*CP)     conv2 input staging (3 lane-concatenated taps)
        # y2_ref    : (r, C2)        conv2 output staging
        # hin_ref   : (b_tile, L*C2) fc1 input staging
        f32 = jnp.float32

        # ---- layer1: Conv1d(1->32, k=5, pad=2) + ReLU, one MXU matmul (K=8). ----
        # Result goes straight into the centre tap (lanes [CP, 2*CP)) of x2.
        w1 = slab_ref[OFF_W1:OFF_W1 + KP, :]                     # (KP, CP)
        b1 = slab_ref[OFF_B1:OFF_B1 + 1, :]                      # (1, CP)
        y1 = jnp.dot(patch_ref[...], w1, preferred_element_type=f32)
        x2_ref[:, CP:2 * CP] = jnp.maximum(y1 + b1, 0.0)

        # ---- conv2 input staging: lane-concatenate the 3 taps so conv2 becomes
        # ONE K = K2*CP = 192 matmul. Taps are 8-row-aligned shifted copies of
        # the centre tap.  Halo rows (positions -1 and L) are written as zeros
        # unconditionally every grid step (never guard with program_id==0: under
        # megacore sharding the second core never executes step 0).
        x2_ref[0:b_tile, 0:CP] = jnp.zeros((b_tile, CP), f32)
        x2_ref[r - b_tile:r, 2 * CP:3 * CP] = jnp.zeros((b_tile, CP), f32)
        for l in range(1, L):            # left tap  -> input position l-1
            x2_ref[l * b_tile:(l + 1) * b_tile, 0:CP] = \
                x2_ref[(l - 1) * b_tile:l * b_tile, CP:2 * CP]
        for l in range(L - 1):           # right tap -> input position l+1
            x2_ref[l * b_tile:(l + 1) * b_tile, 2 * CP:3 * CP] = \
                x2_ref[(l + 1) * b_tile:(l + 2) * b_tile, CP:2 * CP]

        # ---- layer2: Conv1d(32->64, k=3, pad=1) + ReLU as a single matmul. ----
        w2 = slab_ref[OFF_W2:OFF_W2 + K2 * CP, :]                # (192, C2)
        b2 = slab_ref[OFF_B2:OFF_B2 + 1, :]                      # (1, C2)
        y2 = jnp.dot(x2_ref[...], w2, preferred_element_type=f32)
        y2_ref[...] = jnp.maximum(y2 + b2, 0.0)                  # (r, C2)

        # ---- restage (L*b_tile, C2) -> (b_tile, L*C2) so fc1 is ONE K=1024 matmul.
        for l in range(L):
            hin_ref[:, l * C2:(l + 1) * C2] = y2_ref[l * b_tile:(l + 1) * b_tile, :]

        # ---- fc1 + ReLU: single (b_tile, 1024) x (1024, 64) matmul. ----
        wf1 = slab_ref[OFF_FC1W:OFF_FC1W + L * C2, :]            # (1024, H)
        bf1 = slab_ref[OFF_FC1B:OFF_FC1B + 1, :]                 # (1, H)
        h = jnp.maximum(
            jnp.dot(hin_ref[...], wf1, preferred_element_type=f32) + bf1, 0.0)

        # nn.Dropout(0.15): identity in eval/inference mode.
        # TODO(synk): training-mode dropout (pltpu.prng_seed + prng_random_bits mask).

        # ---- fc2 + Sigmoid, emitted lane-dense as a (1, b_tile) row. ----
        # fc2 weight block is 8 rows (rows 1..7 zero) so the MXU sees M=8;
        # contraction on the feature dim of both operands (q @ k^T pattern).
        wf2 = slab_ref[OFF_FC2W:OFF_FC2W + 8, :]                 # (8, H)
        bf2 = slab_ref[OFF_FC2B:OFF_FC2B + 1, 0:1]               # (1, 1)
        logit8 = jax.lax.dot_general(wf2, h, (((1,), (1,)), ((), ())),
                                     preferred_element_type=f32)  # (8, b_tile)
        logit = logit8[0:1, :] + bf2                              # (1, b_tile)
        out_ref[...] = jax.nn.sigmoid(logit).reshape(1, 1, b_tile)

    return kernel, r


def pack_params(params):
    """One-time packing of all weights/biases into one (SLAB_ROWS, 64) f32 slab.

    Hoisted out of the per-call forward path: for fixed inference weights this
    runs once at weight-load time; the forward only DMAs the packed slab.
    """
    w1, b1, w2, b2, fc1w, fc1b, fc2w, fc2b = params
    f32 = jnp.float32

    def pad8(a):
        return jnp.pad(a, ((0, 8 - a.shape[0]), (0, 0)))

    # conv1 (C1,1,K1) -> (KP, CP); extra taps / channels are zero.
    w1_k = jnp.zeros((KP, CP), f32).at[:K1, :C1].set(w1[:, 0, :].T.astype(f32))
    b1_k = jnp.zeros((1, CP), f32).at[:, :C1].set(b1[None, :].astype(f32))
    # conv2 (C2,C1,K2) -> rows k*CP + c (matches the fused 192-lane x2 layout).
    w2_k = jnp.zeros((K2, CP, C2), f32).at[:, :C1, :].set(
        jnp.transpose(w2, (2, 1, 0)).astype(f32)).reshape(K2 * CP, C2)
    b2_k = b2.reshape(1, C2).astype(f32)
    # fc1 (H, C2*L) with PyTorch flatten index c*L + l -> rows ordered l*C2 + c.
    fc1w_k = fc1w.reshape(H, C2, L).transpose(2, 1, 0).reshape(L * C2, H).astype(f32)
    fc1b_k = fc1b.reshape(1, H).astype(f32)
    fc2w_k = fc2w.reshape(1, H).astype(f32)
    fc2b_k = jnp.zeros((1, C2), f32).at[0, 0].set(fc2b[0].astype(f32))

    slab = jnp.concatenate(
        [w1_k, pad8(b1_k), w2_k, pad8(b2_k),
         fc1w_k, pad8(fc1b_k), pad8(fc2w_k), pad8(fc2b_k)], axis=0)
    assert slab.shape == (SLAB_ROWS, CP)
    return slab


def _round_up(a, m):
    return ((a + m - 1) // m) * m


def _im2col_patches(xp, b_tile):
    """x: (b_pad, L) -> (nb*b_tile*L, KP) patch rows, row = l*b_tile + b_local."""
    bp = xp.shape[0]
    nb = bp // b_tile
    # conv1 padding=2 on the left; right padded out to KP-1 taps (zero weights).
    xpad = jnp.pad(xp, ((0, 0), (K1 // 2, KP - 1 - K1 // 2)))
    p = jnp.stack([xpad[:, k:k + L] for k in range(KP)], axis=-1)   # (bp, L, KP)
    p = p.reshape(nb, b_tile, L, KP).transpose(0, 2, 1, 3).reshape(nb * b_tile * L, KP)
    return p


@jax.jit
def simple_cnn_forward(x, slab):
    """x: (B, L) float32, slab: packed params -> (B,) float32 (forward + squeeze)."""
    b = x.shape[0]
    # Batch-tile policy: one big tile for small batches; 128-row tiles otherwise,
    # which guarantees nb >= 2 so the "parallel" grid axis feeds both v7x cores.
    if b <= 128:
        b_tile = _round_up(b, 8)
    else:
        b_tile = 128
    b_pad = _round_up(b, b_tile)
    nb = b_pad // b_tile

    kernel, r = _make_kernel(b_tile)
    xp = jnp.pad(x.astype(jnp.float32), ((0, b_pad - b), (0, 0)))
    # im2col kept in the (jitted) wrapper; folding it into the kernel would cut
    # the 8x input inflation but is minor at this arithmetic intensity.
    patches = _im2col_patches(xp, b_tile)            # (nb*r, KP)

    flops = 2 * b_pad * (L * KP * CP + L * (K2 * CP) * C2 + (L * C2) * H + H)
    bytes_accessed = patches.size * 4 + SLAB_ROWS * CP * 4 + b_pad * 4

    out = pl.pallas_call(
        kernel,
        out_shape=jax.ShapeDtypeStruct((nb, 1, b_tile), jnp.float32),
        grid=(nb,),
        in_specs=[
            pl.BlockSpec((r, KP), lambda i: (i, 0)),              # per-tile patches
            pl.BlockSpec((SLAB_ROWS, CP), lambda i: (0, 0)),      # resident params
        ],
        out_specs=pl.BlockSpec((1, 1, b_tile), lambda i: (i, 0, 0)),  # lane-dense row
        scratch_shapes=[
            pltpu.VMEM((r, K2 * CP), jnp.float32),        # conv2 input (3 taps)
            pltpu.VMEM((r, C2), jnp.float32),             # conv2 output
            pltpu.VMEM((b_tile, L * C2), jnp.float32),    # fc1 input
        ],
        compiler_params=pltpu.CompilerParams(
            dimension_semantics=("parallel",)),           # megacore on v7x
        cost_estimate=pl.CostEstimate(
            flops=flops, transcendentals=b_pad, bytes_accessed=bytes_accessed),
    )(patches, slab)
    return out.reshape(b_pad)[:b]


def ref_forward(x, params):
    """Pure-JAX reference mirroring the PyTorch forward (NCW layout)."""
    w1, b1, w2, b2, fc1w, fc1b, fc2w, fc2b = params
    xpad = jnp.pad(x, ((0, 0), (K1 // 2, K1 // 2)))
    p1 = jnp.stack([xpad[:, k:k + L] for k in range(K1)], axis=1)      # (B,K1,L)
    y1 = jnp.einsum('bkl,ck->bcl', p1, w1[:, 0, :]) + b1[None, :, None]
    y1 = jnp.maximum(y1, 0.0)                                          # (B,C1,L)
    y1p = jnp.pad(y1, ((0, 0), (0, 0), (1, 1)))
    p2 = jnp.stack([y1p[:, :, k:k + L] for k in range(K2)], axis=2)    # (B,C1,K2,L)
    y2 = jnp.einsum('bikl,oik->bol', p2, w2) + b2[None, :, None]
    y2 = jnp.maximum(y2, 0.0)                                          # (B,C2,L)
    flat = y2.reshape(x.shape[0], C2 * L)
    h = jnp.maximum(flat @ fc1w.T + fc1b, 0.0)
    logit = h @ fc2w.T + fc2b
    return jax.nn.sigmoid(logit)[:, 0]


def init_params(key):
    ks = jax.random.split(key, 8)
    s = 0.1
    w1 = jax.random.normal(ks[0], (C1, 1, K1), jnp.float32) * s
    b1 = jax.random.normal(ks[1], (C1,), jnp.float32) * s
    w2 = jax.random.normal(ks[2], (C2, C1, K2), jnp.float32) * s
    b2 = jax.random.normal(ks[3], (C2,), jnp.float32) * s
    fc1w = jax.random.normal(ks[4], (H, C2 * L), jnp.float32) * s
    fc1b = jax.random.normal(ks[5], (H,), jnp.float32) * s
    fc2w = jax.random.normal(ks[6], (1, H), jnp.float32) * s
    fc2b = jax.random.normal(ks[7], (1,), jnp.float32) * s
    return (w1, b1, w2, b2, fc1w, fc1b, fc2w, fc2b)


if __name__ == "__main__":
    key = jax.random.PRNGKey(0)
    pkey, xkey = jax.random.split(key)
    params = init_params(pkey)

    # One-time weight packing, hoisted out of the per-call forward path.
    slab = jax.block_until_ready(pack_params(params))

    # Exercise both code paths: small single-tile batch, and a 2x128-row
    # multi-tile batch (nb = 2 -> both TensorCores on v7x).
    for batch in (16, 256):
        x = jax.random.normal(jax.random.fold_in(xkey, batch), (batch, L), jnp.float32)
        out = jax.block_until_ready(simple_cnn_forward(x, slab))
        ref = jax.block_until_ready(ref_forward(x, params))
        assert out.shape == (batch,)
        assert jnp.allclose(out, ref, atol=1e-3, rtol=1e-3), (batch, out, ref)
    print("KERNEL_OK")
</pallas_src>

<mosaic_0001>
module attributes {stable_mosaic.version = 11 : i64} {
  func.func @kernel(%arg0: i32, %arg1: memref<256x8xf32, #tpu.memory_space<vmem>>, %arg2: memref<1264x64xf32, #tpu.memory_space<vmem>>, %arg3: memref<1x1x16xf32, #tpu.memory_space<vmem>>, %arg4: memref<256x192xf32, #tpu.memory_space<vmem>>, %arg5: memref<256x64xf32, #tpu.memory_space<vmem>>, %arg6: memref<16x1024xf32, #tpu.memory_space<vmem>>) attributes {dimension_semantics = [#tpu.dimension_semantics<parallel>], iteration_bounds = array<i64: 1>, scalar_prefetch = 0 : i64, scratch_operands = 3 : i64, tpu.core_type = #tpu.core_type<tc>, window_params = [{transform_indices = @transform_0, window_bounds = array<i64: 256, 8>}, {pipeline_mode = #tpu.pipeline_mode<synchronous>, transform_indices = @transform_1, window_bounds = array<i64: 1264, 64>}, {transform_indices = @transform_2, window_bounds = array<i64: 1, 1, 16>}]} {
    %c0 = arith.constant 0 : index
    %c0_0 = arith.constant 0 : index
    %0 = vector.load %arg2[%c0, %c0_0] : memref<1264x64xf32, #tpu.memory_space<vmem>>, vector<8x64xf32>
    %c8 = arith.constant 8 : index
    %c0_1 = arith.constant 0 : index
    %1 = vector.load %arg2[%c8, %c0_1] : memref<1264x64xf32, #tpu.memory_space<vmem>>, vector<1x64xf32>
    %c0_2 = arith.constant 0 : index
    %c0_3 = arith.constant 0 : index
    %2 = vector.load %arg1[%c0_2, %c0_3] : memref<256x8xf32, #tpu.memory_space<vmem>>, vector<256x8xf32>
    %cst = arith.constant dense<0.000000e+00> : vector<256x64xf32>
    %3 = tpu.matmul %2, %0, %cst {dimension_numbers = #tpu.dot_dimension_numbers<[1], [0], [0], [1], [0, 0, 1, 1], [], []>} : vector<256x8xf32>, vector<8x64xf32>, vector<256x64xf32> -> vector<256x64xf32>
    %4 = vector.broadcast %1 : vector<1x64xf32> to vector<256x64xf32>
    %5 = arith.addf %3, %4 : vector<256x64xf32>
    %cst_4 = arith.constant 0.000000e+00 : f32
    %6 = vector.broadcast %cst_4 : f32 to vector<256x64xf32>
    %7 = arith.maximumf %5, %6 : vector<256x64xf32>
    %c0_5 = arith.constant 0 : index
    %c64 = arith.constant 64 : index
    %8 = vector.load %arg4[%c0_5, %c64] : memref<256x192xf32, #tpu.memory_space<vmem>>, vector<256x64xf32>
    tpu.vector_store %arg4[%c0_5, %c64], %7 {strides = array<i32>} : memref<256x192xf32, #tpu.memory_space<vmem>>, vector<256x64xf32>,
    %cst_6 = arith.constant 0.000000e+00 : f32
    %9 = vector.broadcast %cst_6 : f32 to vector<16x64xf32>
    %c0_7 = arith.constant 0 : index
    %c0_8 = arith.constant 0 : index
    %10 = vector.load %arg4[%c0_7, %c0_8] : memref<256x192xf32, #tpu.memory_space<vmem>>, vector<16x64xf32>
    tpu.vector_store %arg4[%c0_7, %c0_8], %9 {strides = array<i32>} : memref<256x192xf32, #tpu.memory_space<vmem>>, vector<16x64xf32>,
    %cst_9 = arith.constant 0.000000e+00 : f32
    %11 = vector.broadcast %cst_9 : f32 to vector<16x64xf32>
    %c240 = arith.constant 240 : index
    %c128 = arith.constant 128 : index
    %12 = vector.load %arg4[%c240, %c128] : memref<256x192xf32, #tpu.memory_space<vmem>>, vector<16x64xf32>
    tpu.vector_store %arg4[%c240, %c128], %11 {strides = array<i32>} : memref<256x192xf32, #tpu.memory_space<vmem>>, vector<16x64xf32>,
    %c0_10 = arith.constant 0 : index
    %c64_11 = arith.constant 64 : index
    %13 = vector.load %arg4[%c0_10, %c64_11] : memref<256x192xf32, #tpu.memory_space<vmem>>, vector<16x64xf32>
    %c16 = arith.constant 16 : index
    %c0_12 = arith.constant 0 : index
    %14 = vector.load %arg4[%c16, %c0_12] : memref<256x192xf32, #tpu.memory_space<vmem>>, vector<16x64xf32>
    tpu.vector_store %arg4[%c16, %c0_12], %13 {strides = array<i32>} : memref<256x192xf32, #tpu.memory_space<vmem>>, vector<16x64xf32>,
    %c16_13 = arith.constant 16 : index
    %c64_14 = arith.constant 64 : index
    %15 = vector.load %arg4[%c16_13, %c64_14] : memref<256x192xf32, #tpu.memory_space<vmem>>, vector<16x64xf32>
    %c32 = arith.constant 32 : index
    %c0_15 = arith.constant 0 : index
    %16 = vector.load %arg4[%c32, %c0_15] : memref<256x192xf32, #tpu.memory_space<vmem>>, vector<16x64xf32>
    tpu.vector_store %arg4[%c32, %c0_15], %15 {strides = array<i32>} : memref<256x192xf32, #tpu.memory_space<vmem>>, vector<16x64xf32>,
    %c32_16 = arith.constant 32 : index
    %c64_17 = arith.constant 64 : index
    %17 = vector.load %arg4[%c32_16, %c64_17] : memref<256x192xf32, #tpu.memory_space<vmem>>, vector<16x64xf32>
    %c48 = arith.constant 48 : index
    %c0_18 = arith.constant 0 : index
    %18 = vector.load %arg4[%c48, %c0_18] : memref<256x192xf32, #tpu.memory_space<vmem>>, vector<16x64xf32>
    tpu.vector_store %arg4[%c48, %c0_18], %17 {strides = array<i32>} : memref<256x192xf32, #tpu.memory_space<vmem>>, vector<16x64xf32>,
    %c48_19 = arith.constant 48 : index
    %c64_20 = arith.constant 64 : index
    %19 = vector.load %arg4[%c48_19, %c64_20] : memref<256x192xf32, #tpu.memory_space<vmem>>, vector<16x64xf32>
    %c64_21 = arith.constant 64 : index
    %c0_22 = arith.constant 0 : index
    %20 = vector.load %arg4[%c64_21, %c0_22] : memref<256x192xf32, #tpu.memory_space<vmem>>, vector<16x64xf32>
    tpu.vector_store %arg4[%c64_21, %c0_22], %19 {strides = array<i32>} : memref<256x192xf32, #tpu.memory_space<vmem>>, vector<16x64xf32>,
    %c64_23 = arith.constant 64 : index
    %c64_24 = arith.constant 64 : index
    %21 = vector.load %arg4[%c64_23, %c64_24] : memref<256x192xf32, #tpu.memory_space<vmem>>, vector<16x64xf32>
    %c80 = arith.constant 80 : index
    %c0_25 = arith.constant 0 : index
    %22 = vector.load %arg4[%c80, %c0_25] : memref<256x192xf32, #tpu.memory_space<vmem>>, vector<16x64xf32>
    tpu.vector_store %arg4[%c80, %c0_25], %21 {strides = array<i32>} : memref<256x192xf32, #tpu.memory_space<vmem>>, vector<16x64xf32>,
    %c80_26 = arith.constant 80 : index
    %c64_27 = arith.constant 64 : index
    %23 = vector.load %arg4[%c80_26, %c64_27] : memref<256x192xf32, #tpu.memory_space<vmem>>, vector<16x64xf32>
    %c96 = arith.constant 96 : index
    %c0_28 = arith.constant 0 : index
    %24 = vector.load %arg4[%c96, %c0_28] : memref<256x192xf32, #tpu.memory_space<vmem>>, vector<16x64xf32>
    tpu.vector_store %arg4[%c96, %c0_28], %23 {strides = array<i32>} : memref<256x192xf32, #tpu.memory_space<vmem>>, vector<16x64xf32>,
    %c96_29 = arith.constant 96 : index
    %c64_30 = arith.constant 64 : index
    %25 = vector.load %arg4[%c96_29, %c64_30] : memref<256x192xf32, #tpu.memory_space<vmem>>, vector<16x64xf32>
    %c112 = arith.constant 112 : index
    %c0_31 = arith.constant 0 : index
    %26 = vector.load %arg4[%c112, %c0_31] : memref<256x192xf32, #tpu.memory_space<vmem>>, vector<16x64xf32>
    tpu.vector_store %arg4[%c112, %c0_31], %25 {strides = array<i32>} : memref<256x192xf32, #tpu.memory_space<vmem>>, vector<16x64xf32>,
    %c112_32 = arith.constant 112 : index
    %c64_33 = arith.constant 64 : index
    %27 = vector.load %arg4[%c112_32, %c64_33] : memref<256x192xf32, #tpu.memory_space<vmem>>, vector<16x64xf32>
    %c128_34 = arith.constant 128 : index
    %c0_35 = arith.constant 0 : index
    %28 = vector.load %arg4[%c128_34, %c0_35] : memref<256x192xf32, #tpu.memory_space<vmem>>, vector<16x64xf32>
    tpu.vector_store %arg4[%c128_34, %c0_35], %27 {strides = array<i32>} : memref<256x192xf32, #tpu.memory_space<vmem>>, vector<16x64xf32>,
    %c128_36 = arith.constant 128 : index
    %c64_37 = arith.constant 64 : index
    %29 = vector.load %arg4[%c128_36, %c64_37] : memref<256x192xf32, #tpu.memory_space<vmem>>, vector<16x64xf32>
    %c144 = arith.constant 144 : index
    %c0_38 = arith.constant 0 : index
    %30 = vector.load %arg4[%c144, %c0_38] : memref<256x192xf32, #tpu.memory_space<vmem>>, vector<16x64xf32>
    tpu.vector_store %arg4[%c144, %c0_38], %29 {strides = array<i32>} : memref<256x192xf32, #tpu.memory_space<vmem>>, vector<16x64xf32>,
    %c144_39 = arith.constant 144 : index
    %c64_40 = arith.constant 64 : index
    %31 = vector.load %arg4[%c144_39, %c64_40] : memref<256x192xf32, #tpu.memory_space<vmem>>, vector<16x64xf32>
    %c160 = arith.constant 160 : index
    %c0_41 = arith.constant 0 : index
    %32 = vector.load %arg4[%c160, %c0_41] : memref<256x192xf32, #tpu.memory_space<vmem>>, vector<16x64xf32>
    tpu.vector_store %arg4[%c160, %c0_41], %31 {strides = array<i32>} : memref<256x192xf32, #tpu.memory_space<vmem>>, vector<16x64xf32>,
    %c160_42 = arith.constant 160 : index
    %c64_43 = arith.constant 64 : index
    %33 = vector.load %arg4[%c160_42, %c64_43] : memref<256x192xf32, #tpu.memory_space<vmem>>, vector<16x64xf32>
    %c176 = arith.constant 176 : index
    %c0_44 = arith.constant 0 : index
    %34 = vector.load %arg4[%c176, %c0_44] : memref<256x192xf32, #tpu.memory_space<vmem>>, vector<16x64xf32>
    tpu.vector_store %arg4[%c176, %c0_44], %33 {strides = array<i32>} : memref<256x192xf32, #tpu.memory_space<vmem>>, vector<16x64xf32>,
    %c176_45 = arith.constant 176 : index
    %c64_46 = arith.constant 64 : index
    %35 = vector.load %arg4[%c176_45, %c64_46] : memref<256x192xf32, #tpu.memory_space<vmem>>, vector<16x64xf32>
    %c192 = arith.constant 192 : index
    %c0_47 = arith.constant 0 : index
    %36 = vector.load %arg4[%c192, %c0_47] : memref<256x192xf32, #tpu.memory_space<vmem>>, vector<16x64xf32>
    tpu.vector_store %arg4[%c192, %c0_47], %35 {strides = array<i32>} : memref<256x192xf32, #tpu.memory_space<vmem>>, vector<16x64xf32>,
    %c192_48 = arith.constant 192 : index
    %c64_49 = arith.constant 64 : index
    %37 = vector.load %arg4[%c192_48, %c64_49] : memref<256x192xf32, #tpu.memory_space<vmem>>, vector<16x64xf32>
    %c208 = arith.constant 208 : index
    %c0_50 = arith.constant 0 : index
    %38 = vector.load %arg4[%c208, %c0_50] : memref<256x192xf32, #tpu.memory_space<vmem>>, vector<16x64xf32>
    tpu.vector_store %arg4[%c208, %c0_50], %37 {strides = array<i32>} : memref<256x192xf32, #tpu.memory_space<vmem>>, vector<16x64xf32>,
    %c208_51 = arith.constant 208 : index
    %c64_52 = arith.constant 64 : index
    %39 = vector.load %arg4[%c208_51, %c64_52] : memref<256x192xf32, #tpu.memory_space<vmem>>, vector<16x64xf32>
    %c224 = arith.constant 224 : index
    %c0_53 = arith.constant 0 : index
    %40 = vector.load %arg4[%c224, %c0_53] : memref<256x192xf32, #tpu.memory_space<vmem>>, vector<16x64xf32>
    tpu.vector_store %arg4[%c224, %c0_53], %39 {strides = array<i32>} : memref<256x192xf32, #tpu.memory_space<vmem>>, vector<16x64xf32>,
    %c224_54 = arith.constant 224 : index
    %c64_55 = arith.constant 64 : index
    %41 = vector.load %arg4[%c224_54, %c64_55] : memref<256x192xf32, #tpu.memory_space<vmem>>, vector<16x64xf32>
    %c240_56 = arith.constant 240 : index
    %c0_57 = arith.constant 0 : index
    %42 = vector.load %arg4[%c240_56, %c0_57] : memref<256x192xf32, #tpu.memory_space<vmem>>, vector<16x64xf32>
    tpu.vector_store %arg4[%c240_56, %c0_57], %41 {strides = array<i32>} : memref<256x192xf32, #tpu.memory_space<vmem>>, vector<16x64xf32>,
    %c16_58 = arith.constant 16 : index
    %c64_59 = arith.constant 64 : index
    %43 = vector.load %arg4[%c16_58, %c64_59] : memref<256x192xf32, #tpu.memory_space<vmem>>, vector<16x64xf32>
    %c0_60 = arith.constant 0 : index
    %c128_61 = arith.constant 128 : index
    %44 = vector.load %arg4[%c0_60, %c128_61] : memref<256x192xf32, #tpu.memory_space<vmem>>, vector<16x64xf32>
    tpu.vector_store %arg4[%c0_60, %c128_61], %43 {strides = array<i32>} : memref<256x192xf32, #tpu.memory_space<vmem>>, vector<16x64xf32>,
    %c32_62 = arith.constant 32 : index
    %c64_63 = arith.constant 64 : index
    %45 = vector.load %arg4[%c32_62, %c64_63] : memref<256x192xf32, #tpu.memory_space<vmem>>, vector<16x64xf32>
    %c16_64 = arith.constant 16 : index
    %c128_65 = arith.constant 128 : index
    %46 = vector.load %arg4[%c16_64, %c128_65] : memref<256x192xf32, #tpu.memory_space<vmem>>, vector<16x64xf32>
    tpu.vector_store %arg4[%c16_64, %c128_65], %45 {strides = array<i32>} : memref<256x192xf32, #tpu.memory_space<vmem>>, vector<16x64xf32>,
    %c48_66 = arith.constant 48 : index
    %c64_67 = arith.constant 64 : index
    %47 = vector.load %arg4[%c48_66, %c64_67] : memref<256x192xf32, #tpu.memory_space<vmem>>, vector<16x64xf32>
    %c32_68 = arith.constant 32 : index
    %c128_69 = arith.constant 128 : index
    %48 = vector.load %arg4[%c32_68, %c128_69] : memref<256x192xf32, #tpu.memory_space<vmem>>, vector<16x64xf32>
    tpu.vector_store %arg4[%c32_68, %c128_69], %47 {strides = array<i32>} : memref<256x192xf32, #tpu.memory_space<vmem>>, vector<16x64xf32>,
    %c64_70 = arith.constant 64 : index
    %c64_71 = arith.constant 64 : index
    %49 = vector.load %arg4[%c64_70, %c64_71] : memref<256x192xf32, #tpu.memory_space<vmem>>, vector<16x64xf32>
    %c48_72 = arith.constant 48 : index
    %c128_73 = arith.constant 128 : index
    %50 = vector.load %arg4[%c48_72, %c128_73] : memref<256x192xf32, #tpu.memory_space<vmem>>, vector<16x64xf32>
    tpu.vector_store %arg4[%c48_72, %c128_73], %49 {strides = array<i32>} : memref<256x192xf32, #tpu.memory_space<vmem>>, vector<16x64xf32>,
    %c80_74 = arith.constant 80 : index
    %c64_75 = arith.constant 64 : index
    %51 = vector.load %arg4[%c80_74, %c64_75] : memref<256x192xf32, #tpu.memory_space<vmem>>, vector<16x64xf32>
    %c64_76 = arith.constant 64 : index
    %c128_77 = arith.constant 128 : index
    %52 = vector.load %arg4[%c64_76, %c128_77] : memref<256x192xf32, #tpu.memory_space<vmem>>, vector<16x64xf32>
    tpu.vector_store %arg4[%c64_76, %c128_77], %51 {strides = array<i32>} : memref<256x192xf32, #tpu.memory_space<vmem>>, vector<16x64xf32>,
    %c96_78 = arith.constant 96 : index
    %c64_79 = arith.constant 64 : index
    %53 = vector.load %arg4[%c96_78, %c64_79] : memref<256x192xf32, #tpu.memory_space<vmem>>, vector<16x64xf32>
    %c80_80 = arith.constant 80 : index
    %c128_81 = arith.constant 128 : index
    %54 = vector.load %arg4[%c80_80, %c128_81] : memref<256x192xf32, #tpu.memory_space<vmem>>, vector<16x64xf32>
    tpu.vector_store %arg4[%c80_80, %c128_81], %53 {strides = array<i32>} : memref<256x192xf32, #tpu.memory_space<vmem>>, vector<16x64xf32>,
    %c112_82 = arith.constant 112 : index
    %c64_83 = arith.constant 64 : index
    %55 = vector.load %arg4[%c112_82, %c64_83] : memref<256x192xf32, #tpu.memory_space<vmem>>, vector<16x64xf32>
    %c96_84 = arith.constant 96 : index
    %c128_85 = arith.constant 128 : index
    %56 = vector.load %arg4[%c96_84, %c128_85] : memref<256x192xf32, #tpu.memory_space<vmem>>, vector<16x64xf32>
    tpu.vector_store %arg4[%c96_84, %c128_85], %55 {strides = array<i32>} : memref<256x192xf32, #tpu.memory_space<vmem>>, vector<16x64xf32>,
    %c128_86 = arith.constant 128 : index
    %c64_87 = arith.constant 64 : index
    %57 = vector.load %arg4[%c128_86, %c64_87] : memref<256x192xf32, #tpu.memory_space<vmem>>, vector<16x64xf32>
    %c112_88 = arith.constant 112 : index
    %c128_89 = arith.constant 128 : index
    %58 = vector.load %arg4[%c112_88, %c128_89] : memref<256x192xf32, #tpu.memory_space<vmem>>, vector<16x64xf32>
    tpu.vector_store %arg4[%c112_88, %c128_89], %57 {strides = array<i32>} : memref<256x192xf32, #tpu.memory_space<vmem>>, vector<16x64xf32>,
    %c144_90 = arith.constant 144 : index
    %c64_91 = arith.constant 64 : index
    %59 = vector.load %arg4[%c144_90, %c64_91] : memref<256x192xf32, #tpu.memory_space<vmem>>, vector<16x64xf32>
    %c128_92 = arith.constant 128 : index
    %c128_93 = arith.constant 128 : index
    %60 = vector.load %arg4[%c128_92, %c128_93] : memref<256x192xf32, #tpu.memory_space<vmem>>, vector<16x64xf32>
    tpu.vector_store %arg4[%c128_92, %c128_93], %59 {strides = array<i32>} : memref<256x192xf32, #tpu.memory_space<vmem>>, vector<16x64xf32>,
    %c160_94 = arith.constant 160 : index
    %c64_95 = arith.constant 64 : index
    %61 = vector.load %arg4[%c160_94, %c64_95] : memref<256x192xf32, #tpu.memory_space<vmem>>, vector<16x64xf32>
    %c144_96 = arith.constant 144 : index
    %c128_97 = arith.constant 128 : index
    %62 = vector.load %arg4[%c144_96, %c128_97] : memref<256x192xf32, #tpu.memory_space<vmem>>, vector<16x64xf32>
    tpu.vector_store %arg4[%c144_96, %c128_97], %61 {strides = array<i32>} : memref<256x192xf32, #tpu.memory_space<vmem>>, vector<16x64xf32>,
    %c176_98 = arith.constant 176 : index
    %c64_99 = arith.constant 64 : index
    %63 = vector.load %arg4[%c176_98, %c64_99] : memref<256x192xf32, #tpu.memory_space<vmem>>, vector<16x64xf32>
    %c160_100 = arith.constant 160 : index
    %c128_101 = arith.constant 128 : index
    %64 = vector.load %arg4[%c160_100, %c128_101] : memref<256x192xf32, #tpu.memory_space<vmem>>, vector<16x64xf32>
    tpu.vector_store %arg4[%c160_100, %c128_101], %63 {strides = array<i32>} : memref<256x192xf32, #tpu.memory_space<vmem>>, vector<16x64xf32>,
    %c192_102 = arith.constant 192 : index
    %c64_103 = arith.constant 64 : index
    %65 = vector.load %arg4[%c192_102, %c64_103] : memref<256x192xf32, #tpu.memory_space<vmem>>, vector<16x64xf32>
    %c176_104 = arith.constant 176 : index
    %c128_105 = arith.constant 128 : index
    %66 = vector.load %arg4[%c176_104, %c128_105] : memref<256x192xf32, #tpu.memory_space<vmem>>, vector<16x64xf32>
    tpu.vector_store %arg4[%c176_104, %c128_105], %65 {strides = array<i32>} : memref<256x192xf32, #tpu.memory_space<vmem>>, vector<16x64xf32>,
    %c208_106 = arith.constant 208 : index
    %c64_107 = arith.constant 64 : index
    %67 = vector.load %arg4[%c208_106, %c64_107] : memref<256x192xf32, #tpu.memory_space<vmem>>, vector<16x64xf32>
    %c192_108 = arith.constant 192 : index
    %c128_109 = arith.constant 128 : index
    %68 = vector.load %arg4[%c192_108, %c128_109] : memref<256x192xf32, #tpu.memory_space<vmem>>, vector<16x64xf32>
    tpu.vector_store %arg4[%c192_108, %c128_109], %67 {strides = array<i32>} : memref<256x192xf32, #tpu.memory_space<vmem>>, vector<16x64xf32>,
    %c224_110 = arith.constant 224 : index
    %c64_111 = arith.constant 64 : index
    %69 = vector.load %arg4[%c224_110, %c64_111] : memref<256x192xf32, #tpu.memory_space<vmem>>, vector<16x64xf32>
    %c208_112 = arith.constant 208 : index
    %c128_113 = arith.constant 128 : index
    %70 = vector.load %arg4[%c208_112, %c128_113] : memref<256x192xf32, #tpu.memory_space<vmem>>, vector<16x64xf32>
    tpu.vector_store %arg4[%c208_112, %c128_113], %69 {strides = array<i32>} : memref<256x192xf32, #tpu.memory_space<vmem>>, vector<16x64xf32>,
    %c240_114 = arith.constant 240 : index
    %c64_115 = arith.constant 64 : index
    %71 = vector.load %arg4[%c240_114, %c64_115] : memref<256x192xf32, #tpu.memory_space<vmem>>, vector<16x64xf32>
    %c224_116 = arith.constant 224 : index
    %c128_117 = arith.constant 128 : index
    %72 = vector.load %arg4[%c224_116, %c128_117] : memref<256x192xf32, #tpu.memory_space<vmem>>, vector<16x64xf32>
    tpu.vector_store %arg4[%c224_116, %c128_117], %71 {strides = array<i32>} : memref<256x192xf32, #tpu.memory_space<vmem>>, vector<16x64xf32>,
    %c16_118 = arith.constant 16 : index
    %c0_119 = arith.constant 0 : index
    %73 = vector.load %arg2[%c16_118, %c0_119] : memref<1264x64xf32, #tpu.memory_space<vmem>>, vector<192x64xf32>
    %c208_120 = arith.constant 208 : index
    %c0_121 = arith.constant 0 : index
    %74 = vector.load %arg2[%c208_120, %c0_121] : memref<1264x64xf32, #tpu.memory_space<vmem>>, vector<1x64xf32>
    %c0_122 = arith.constant 0 : index
    %c0_123 = arith.constant 0 : index
    %75 = vector.load %arg4[%c0_122, %c0_123] : memref<256x192xf32, #tpu.memory_space<vmem>>, vector<256x192xf32>
    %cst_124 = arith.constant dense<0.000000e+00> : vector<256x64xf32>
    %76 = tpu.matmul %75, %73, %cst_124 {dimension_numbers = #tpu.dot_dimension_numbers<[1], [0], [0], [1], [0, 0, 1, 1], [], []>} : vector<256x192xf32>, vector<192x64xf32>, vector<256x64xf32> -> vector<256x64xf32>
    %77 = vector.broadcast %74 : vector<1x64xf32> to vector<256x64xf32>
    %78 = arith.addf %76, %77 : vector<256x64xf32>
    %cst_125 = arith.constant 0.000000e+00 : f32
    %79 = vector.broadcast %cst_125 : f32 to vector<256x64xf32>
    %80 = arith.maximumf %78, %79 : vector<256x64xf32>
    %c0_126 = arith.constant 0 : index
    %c0_127 = arith.constant 0 : index
    %81 = vector.load %arg5[%c0_126, %c0_127] : memref<256x64xf32, #tpu.memory_space<vmem>>, vector<256x64xf32>
    tpu.vector_store %arg5[%c0_126, %c0_127], %80 {strides = array<i32>} : memref<256x64xf32, #tpu.memory_space<vmem>>, vector<256x64xf32>,
    %c0_128 = arith.constant 0 : index
    %c0_129 = arith.constant 0 : index
    %82 = vector.load %arg5[%c0_128, %c0_129] : memref<256x64xf32, #tpu.memory_space<vmem>>, vector<16x64xf32>
    %c0_130 = arith.constant 0 : index
    %c0_131 = arith.constant 0 : index
    %83 = vector.load %arg6[%c0_130, %c0_131] : memref<16x1024xf32, #tpu.memory_space<vmem>>, vector<16x64xf32>
    tpu.vector_store %arg6[%c0_130, %c0_131], %82 {strides = array<i32>} : memref<16x1024xf32, #tpu.memory_space<vmem>>, vector<16x64xf32>,
    %c16_132 = arith.constant 16 : index
    %c0_133 = arith.constant 0 : index
    %84 = vector.load %arg5[%c16_132, %c0_133] : memref<256x64xf32, #tpu.memory_space<vmem>>, vector<16x64xf32>
    %c0_134 = arith.constant 0 : index
    %c64_135 = arith.constant 64 : index
    %85 = vector.load %arg6[%c0_134, %c64_135] : memref<16x1024xf32, #tpu.memory_space<vmem>>, vector<16x64xf32>
    tpu.vector_store %arg6[%c0_134, %c64_135], %84 {strides = array<i32>} : memref<16x1024xf32, #tpu.memory_space<vmem>>, vector<16x64xf32>,
    %c32_136 = arith.constant 32 : index
    %c0_137 = arith.constant 0 : index
    %86 = vector.load %arg5[%c32_136, %c0_137] : memref<256x64xf32, #tpu.memory_space<vmem>>, vector<16x64xf32>
    %c0_138 = arith.constant 0 : index
    %c128_139 = arith.constant 128 : index
    %87 = vector.load %arg6[%c0_138, %c128_139] : memref<16x1024xf32, #tpu.memory_space<vmem>>, vector<16x64xf32>
    tpu.vector_store %arg6[%c0_138, %c128_139], %86 {strides = array<i32>} : memref<16x1024xf32, #tpu.memory_space<vmem>>, vector<16x64xf32>,
    %c48_140 = arith.constant 48 : index
    %c0_141 = arith.constant 0 : index
    %88 = vector.load %arg5[%c48_140, %c0_141] : memref<256x64xf32, #tpu.memory_space<vmem>>, vector<16x64xf32>
    %c0_142 = arith.constant 0 : index
    %c192_143 = arith.constant 192 : index
    %89 = vector.load %arg6[%c0_142, %c192_143] : memref<16x1024xf32, #tpu.memory_space<vmem>>, vector<16x64xf32>
    tpu.vector_store %arg6[%c0_142, %c192_143], %88 {strides = array<i32>} : memref<16x1024xf32, #tpu.memory_space<vmem>>, vector<16x64xf32>,
    %c64_144 = arith.constant 64 : index
    %c0_145 = arith.constant 0 : index
    %90 = vector.load %arg5[%c64_144, %c0_145] : memref<256x64xf32, #tpu.memory_space<vmem>>, vector<16x64xf32>
    %c0_146 = arith.constant 0 : index
    %c256 = arith.constant 256 : index
    %91 = vector.load %arg6[%c0_146, %c256] : memref<16x1024xf32, #tpu.memory_space<vmem>>, vector<16x64xf32>
    tpu.vector_store %arg6[%c0_146, %c256], %90 {strides = array<i32>} : memref<16x1024xf32, #tpu.memory_space<vmem>>, vector<16x64xf32>,
    %c80_147 = arith.constant 80 : index
    %c0_148 = arith.constant 0 : index
    %92 = vector.load %arg5[%c80_147, %c0_148] : memref<256x64xf32, #tpu.memory_space<vmem>>, vector<16x64xf32>
    %c0_149 = arith.constant 0 : index
    %c320 = arith.constant 320 : index
    %93 = vector.load %arg6[%c0_149, %c320] : memref<16x1024xf32, #tpu.memory_space<vmem>>, vector<16x64xf32>
    tpu.vector_store %arg6[%c0_149, %c320], %92 {strides = array<i32>} : memref<16x1024xf32, #tpu.memory_space<vmem>>, vector<16x64xf32>,
    %c96_150 = arith.constant 96 : index
    %c0_151 = arith.constant 0 : index
    %94 = vector.load %arg5[%c96_150, %c0_151] : memref<256x64xf32, #tpu.memory_space<vmem>>, vector<16x64xf32>
    %c0_152 = arith.constant 0 : index
    %c384 = arith.constant 384 : index
    %95 = vector.load %arg6[%c0_152, %c384] : memref<16x1024xf32, #tpu.memory_space<vmem>>, vector<16x64xf32>
    tpu.vector_store %arg6[%c0_152, %c384], %94 {strides = array<i32>} : memref<16x1024xf32, #tpu.memory_space<vmem>>, vector<16x64xf32>,
    %c112_153 = arith.constant 112 : index
    %c0_154 = arith.constant 0 : index
    %96 = vector.load %arg5[%c112_153, %c0_154] : memref<256x64xf32, #tpu.memory_space<vmem>>, vector<16x64xf32>
    %c0_155 = arith.constant 0 : index
    %c448 = arith.constant 448 : index
    %97 = vector.load %arg6[%c0_155, %c448] : memref<16x1024xf32, #tpu.memory_space<vmem>>, vector<16x64xf32>
    tpu.vector_store %arg6[%c0_155, %c448], %96 {strides = array<i32>} : memref<16x1024xf32, #tpu.memory_space<vmem>>, vector<16x64xf32>,
    %c128_156 = arith.constant 128 : index
    %c0_157 = arith.constant 0 : index
    %98 = vector.load %arg5[%c128_156, %c0_157] : memref<256x64xf32, #tpu.memory_space<vmem>>, vector<16x64xf32>
    %c0_158 = arith.constant 0 : index
    %c512 = arith.constant 512 : index
    %99 = vector.load %arg6[%c0_158, %c512] : memref<16x1024xf32, #tpu.memory_space<vmem>>, vector<16x64xf32>
    tpu.vector_store %arg6[%c0_158, %c512], %98 {strides = array<i32>} : memref<16x1024xf32, #tpu.memory_space<vmem>>, vector<16x64xf32>,
    %c144_159 = arith.constant 144 : index
    %c0_160 = arith.constant 0 : index
    %100 = vector.load %arg5[%c144_159, %c0_160] : memref<256x64xf32, #tpu.memory_space<vmem>>, vector<16x64xf32>
    %c0_161 = arith.constant 0 : index
    %c576 = arith.constant 576 : index
    %101 = vector.load %arg6[%c0_161, %c576] : memref<16x1024xf32, #tpu.memory_space<vmem>>, vector<16x64xf32>
    tpu.vector_store %arg6[%c0_161, %c576], %100 {strides = array<i32>} : memref<16x1024xf32, #tpu.memory_space<vmem>>, vector<16x64xf32>,
    %c160_162 = arith.constant 160 : index
    %c0_163 = arith.constant 0 : index
    %102 = vector.load %arg5[%c160_162, %c0_163] : memref<256x64xf32, #tpu.memory_space<vmem>>, vector<16x64xf32>
    %c0_164 = arith.constant 0 : index
    %c640 = arith.constant 640 : index
    %103 = vector.load %arg6[%c0_164, %c640] : memref<16x1024xf32, #tpu.memory_space<vmem>>, vector<16x64xf32>
    tpu.vector_store %arg6[%c0_164, %c640], %102 {strides = array<i32>} : memref<16x1024xf32, #tpu.memory_space<vmem>>, vector<16x64xf32>,
    %c176_165 = arith.constant 176 : index
    %c0_166 = arith.constant 0 : index
    %104 = vector.load %arg5[%c176_165, %c0_166] : memref<256x64xf32, #tpu.memory_space<vmem>>, vector<16x64xf32>
    %c0_167 = arith.constant 0 : index
    %c704 = arith.constant 704 : index
    %105 = vector.load %arg6[%c0_167, %c704] : memref<16x1024xf32, #tpu.memory_space<vmem>>, vector<16x64xf32>
    tpu.vector_store %arg6[%c0_167, %c704], %104 {strides = array<i32>} : memref<16x1024xf32, #tpu.memory_space<vmem>>, vector<16x64xf32>,
    %c192_168 = arith.constant 192 : index
    %c0_169 = arith.constant 0 : index
    %106 = vector.load %arg5[%c192_168, %c0_169] : memref<256x64xf32, #tpu.memory_space<vmem>>, vector<16x64xf32>
    %c0_170 = arith.constant 0 : index
    %c768 = arith.constant 768 : index
    %107 = vector.load %arg6[%c0_170, %c768] : memref<16x1024xf32, #tpu.memory_space<vmem>>, vector<16x64xf32>
    tpu.vector_store %arg6[%c0_170, %c768], %106 {strides = array<i32>} : memref<16x1024xf32, #tpu.memory_space<vmem>>, vector<16x64xf32>,
    %c208_171 = arith.constant 208 : index
    %c0_172 = arith.constant 0 : index
    %108 = vector.load %arg5[%c208_171, %c0_172] : memref<256x64xf32, #tpu.memory_space<vmem>>, vector<16x64xf32>
    %c0_173 = arith.constant 0 : index
    %c832 = arith.constant 832 : index
    %109 = vector.load %arg6[%c0_173, %c832] : memref<16x1024xf32, #tpu.memory_space<vmem>>, vector<16x64xf32>
    tpu.vector_store %arg6[%c0_173, %c832], %108 {strides = array<i32>} : memref<16x1024xf32, #tpu.memory_space<vmem>>, vector<16x64xf32>,
    %c224_174 = arith.constant 224 : index
    %c0_175 = arith.constant 0 : index
    %110 = vector.load %arg5[%c224_174, %c0_175] : memref<256x64xf32, #tpu.memory_space<vmem>>, vector<16x64xf32>
    %c0_176 = arith.constant 0 : index
    %c896 = arith.constant 896 : index
    %111 = vector.load %arg6[%c0_176, %c896] : memref<16x1024xf32, #tpu.memory_space<vmem>>, vector<16x64xf32>
    tpu.vector_store %arg6[%c0_176, %c896], %110 {strides = array<i32>} : memref<16x1024xf32, #tpu.memory_space<vmem>>, vector<16x64xf32>,
    %c240_177 = arith.constant 240 : index
    %c0_178 = arith.constant 0 : index
    %112 = vector.load %arg5[%c240_177, %c0_178] : memref<256x64xf32, #tpu.memory_space<vmem>>, vector<16x64xf32>
    %c0_179 = arith.constant 0 : index
    %c960 = arith.constant 960 : index
    %113 = vector.load %arg6[%c0_179, %c960] : memref<16x1024xf32, #tpu.memory_space<vmem>>, vector<16x64xf32>
    tpu.vector_store %arg6[%c0_179, %c960], %112 {strides = array<i32>} : memref<16x1024xf32, #tpu.memory_space<vmem>>, vector<16x64xf32>,
    %c216 = arith.constant 216 : index
    %c0_180 = arith.constant 0 : index
    %114 = vector.load %arg2[%c216, %c0_180] : memref<1264x64xf32, #tpu.memory_space<vmem>>, vector<1024x64xf32>
    %c1240 = arith.constant 1240 : index
    %c0_181 = arith.constant 0 : index
    %115 = vector.load %arg2[%c1240, %c0_181] : memref<1264x64xf32, #tpu.memory_space<vmem>>, vector<1x64xf32>
    %c0_182 = arith.constant 0 : index
    %c0_183 = arith.constant 0 : index
    %116 = vector.load %arg6[%c0_182, %c0_183] : memref<16x1024xf32, #tpu.memory_space<vmem>>, vector<16x1024xf32>
    %cst_184 = arith.constant dense<0.000000e+00> : vector<16x64xf32>
    %117 = tpu.matmul %116, %114, %cst_184 {dimension_numbers = #tpu.dot_dimension_numbers<[1], [0], [0], [1], [0, 0, 1, 1], [], []>} : vector<16x1024xf32>, vector<1024x64xf32>, vector<16x64xf32> -> vector<16x64xf32>
    %118 = vector.broadcast %115 : vector<1x64xf32> to vector<16x64xf32>
    %119 = arith.addf %117, %118 : vector<16x64xf32>
    %cst_185 = arith.constant 0.000000e+00 : f32
    %120 = vector.broadcast %cst_185 : f32 to vector<16x64xf32>
    %121 = arith.maximumf %119, %120 : vector<16x64xf32>
    %c1248 = arith.constant 1248 : index
    %c0_186 = arith.constant 0 : index
    %122 = vector.load %arg2[%c1248, %c0_186] : memref<1264x64xf32, #tpu.memory_space<vmem>>, vector<8x64xf32>
    %c1256 = arith.constant 1256 : index
    %c0_187 = arith.constant 0 : index
    %123 = vector.load %arg2[%c1256, %c0_187] : memref<1264x64xf32, #tpu.memory_space<vmem>>, vector<1x1xf32>
    %cst_188 = arith.constant dense<0.000000e+00> : vector<8x16xf32>
    %124 = tpu.matmul %122, %121, %cst_188 {dimension_numbers = #tpu.dot_dimension_numbers<[1], [1], [0], [0], [0, 0, 1, 0], [], []>} : vector<8x64xf32>, vector<16x64xf32>, vector<8x16xf32> -> vector<8x16xf32>
    %125 = vector.extract_strided_slice %124 {offsets = [0, 0], sizes = [1, 16], strides = [1, 1]} : vector<8x16xf32> to vector<1x16xf32>
    %126 = vector.broadcast %123 : vector<1x1xf32> to vector<1x16xf32>
    %127 = arith.addf %125, %126 : vector<1x16xf32>
    %128 = arith.negf %127 : vector<1x16xf32>
    %129 = math.exp %128 : vector<1x16xf32>
    %cst_189 = arith.constant 1.000000e+00 : f32
    %130 = vector.broadcast %cst_189 : f32 to vector<1x16xf32>
    %131 = arith.addf %130, %129 : vector<1x16xf32>
    %132 = arith.divf %130, %131 : vector<1x16xf32>
    %133 = vector.shape_cast %132 : vector<1x16xf32> to vector<1x1x16xf32>
    %c0_190 = arith.constant 0 : index
    %c0_191 = arith.constant 0 : index
    %c0_192 = arith.constant 0 : index
    %134 = vector.load %arg3[%c0_190, %c0_191, %c0_192] : memref<1x1x16xf32, #tpu.memory_space<vmem>>, vector<1x1x16xf32>
    tpu.vector_store %arg3[%c0_190, %c0_191, %c0_192], %133 {strides = array<i32>} : memref<1x1x16xf32, #tpu.memory_space<vmem>>, vector<1x1x16xf32>,
    return
  }
  func.func @transform_0(%arg0: i32) -> (i32, i32) {
    %c0_i32 = arith.constant 0 : i32
    %c0_i32_0 = arith.constant 0 : i32
    return %arg0, %c0_i32 : i32, i32
  }
  func.func @transform_1(%arg0: i32) -> (i32, i32) {
    %c0_i32 = arith.constant 0 : i32
    %c0_i32_0 = arith.constant 0 : i32
    %c0_i32_1 = arith.constant 0 : i32
    return %c0_i32, %c0_i32_0 : i32, i32
  }
  func.func @transform_2(%arg0: i32) -> (i32, i32, i32) {
    %c0_i32 = arith.constant 0 : i32
    %c0_i32_0 = arith.constant 0 : i32
    %c0_i32_1 = arith.constant 0 : i32
    return %arg0, %c0_i32, %c0_i32_0 : i32, i32, i32
  }
}

</mosaic_0001>

<bundles_post_ra>
// kernel: simple_cnn_forward.1
= control target key start
LH: loop header
LB: loop body
LE: loop exit
PB: predicated region body
PF: predicated region fallthrough
CT: control target
= control target key end

     0   :  { %vm50_vm0 = vcmask 64512   ;;  %s3630_s0 = inlined_call_operand.vmem [shape: f32[256,8], index: 0, kind: input, shape index: {}]   ;;  %s3631_s1 = inlined_call_operand.vmem [shape: f32[1264,64], index: 1, kind: input, shape index: {}]   ;;  %s3632_s2 = inlined_call_operand.hbm [shape: f32[1,1,16], index: 2, kind: output, shape index: {}]  }
   0x1   :  { %v12_v0 = vld [vmem:[%s3631_s1] sm:$0xff]  ;;  %v15_v2 = vld [vmem:[%s3630_s0 + $0x8] sm:$0xff]  ;;  %v16_v3 = vld [vmem:[%s3630_s0 + $0x10] sm:$0xff] }
   0x2   :  { %v14_v1 = vld [vmem:[%s3630_s0] sm:$0xff]  ;;  %2355 = vmatprep.subr.mxu0 %v12_v0  ;;  %v17_v4 = vld [vmem:[%s3630_s0 + $0x18] sm:$0xff] }
   0x3   :  { %2357 = vmatprep.mubr.msk.f32.mxu0 %vm50_vm0, %v14_v1  ;;  %2356 = vmatpush3.msra.mxu0 %v12_v0  ;;  %v18_v5 = vld [vmem:[%s3630_s0 + $0x20] sm:$0xff] }
   0x4   :  { %2358 = vmatmul.mubr.msk.f32.vlgmr.msra.gmra.mxu0 %vm50_vm0, %v15_v2 }
   0x5   :  { %2360 = vmatprep.mubr.msk.f32.mxu0 %vm50_vm0, %v16_v3 }
   0x6   :  { %7 = vsyncpa [#allocation6], 0  ;;  %v19_v6 = vld [vmem:[%s3630_s0 + $0x28] sm:$0xff]  ;;  %v20_v7 = vld [vmem:[%s3630_s0 + $0x30] sm:$0xff]  ;;  %vm565_vm1 = vcmask 523264   ;;  %v2444_v24 = vmov 0.0  }
   0x7   :  { %v21_v8 = vld [vmem:[%s3630_s0 + $0x38] sm:$0xff]  ;;  %v22_v9 = vld [vmem:[%s3630_s0 + $0x40] sm:$0xff]  ;;  %v23_v10 = vld [vmem:[%s3630_s0 + $0x48] sm:$0xff]  ;;  %568 = vst.msk [vmem:[#allocation2 + $0x1e8] sm:$0xff] %vm565_vm1, %v2444_v24  ;;  %1119 = vmatprep.subr.mxu1 %v2444_v24  ;;  %s2445_s17 = smov 64   ;;  %vm532_vm2 = vcmask 1048064  }
   0x8   :  { %2361 = vmatmul.mubr.msk.f32.gmra.mxu0 %vm50_vm0, %v17_v4  ;;  %v24_v11 = vld [vmem:[%s3630_s0 + $0x50] sm:$0xff]  ;;  %v25_v12 = vld [vmem:[%s3630_s0 + $0x58] sm:$0xff]  ;;  %v26_v13 = vld [vmem:[%s3630_s0 + $0x60] sm:$0xff]  ;;  %569 = vst.msk [vmem:[#allocation2 + $0x1f8] sm:$0xff] %vm565_vm1, %v2444_v24  ;;  %vm2446_vm3 = vmmov 0   ;;  %s2448_s21 = smov [#allocation5]  }
   0x9   :  { %2363 = vmatprep.mubr.msk.f32.mxu0 %vm50_vm0, %v18_v5  ;;  %v27_v14 = vld [vmem:[%s3630_s0 + $0x68] sm:$0xff]  ;;  %v28_v15 = vld [vmem:[%s3630_s0 + $0x70] sm:$0xff]  ;;  %v29_v16 = vld [vmem:[%s3630_s0 + $0x78] sm:$0xff]  ;;  %vm2080_vm4 = vcmask 122880  }
   0xa   :  { %v30_v17 = vld [vmem:[%s3630_s0 + $0x80] sm:$0xff]  ;;  %v31_v18 = vld [vmem:[%s3630_s0 + $0x88] sm:$0xff]  ;;  %v32_v19 = vld [vmem:[%s3630_s0 + $0x90] sm:$0xff] }
   0xb   :  { %v33_v20 = vld [vmem:[%s3630_s0 + $0x98] sm:$0xff]  ;;  %v34_v21 = vld [vmem:[%s3630_s0 + $0xa0] sm:$0xff]  ;;  %v35_v22 = vld [vmem:[%s3630_s0 + $0xa8] sm:$0xff] }
   0xc   :  { %2364 = vmatmul.mubr.msk.f32.gmra.mxu0 %vm50_vm0, %v19_v6  ;;  %v36_v23 = vld [vmem:[%s3630_s0 + $0xb0] sm:$0xff]  ;;  %v37_v25 = vld [vmem:[%s3630_s0 + $0xb8] sm:$0xff]  ;;  %v38_v26 = vld [vmem:[%s3630_s0 + $0xc0] sm:$0xff] }
   0xd   :  { %2366 = vmatprep.mubr.msk.f32.mxu0 %vm50_vm0, %v20_v7  ;;  %v39_v27 = vld [vmem:[%s3630_s0 + $0xc8] sm:$0xff]  ;;  %v40_v28 = vld [vmem:[%s3630_s0 + $0xd0] sm:$0xff]  ;;  %v41_v29 = vld [vmem:[%s3630_s0 + $0xd8] sm:$0xff] }
   0xe   :  { %v42_v30 = vld [vmem:[%s3630_s0 + $0xe0] sm:$0xff]  ;;  %v43_v31 = vld [vmem:[%s3630_s0 + $0xe8] sm:$0xff] }
   0xf   :  { %v2595_v33 = vld [vmem:[%s3631_s1 + $0x8] ss:$0 sm:$0xff] }
  0x10   :  { %2367 = vmatmul.mubr.msk.f32.gmra.mxu0 %vm50_vm0, %v21_v8 }
  0x11   :  { %2369 = vmatprep.mubr.msk.f32.mxu0 %vm50_vm0, %v22_v9 }
  0x14   :  { %2370 = vmatmul.mubr.msk.f32.gmra.mxu0 %vm50_vm0, %v23_v10 }
  0x15   :  { %2372 = vmatprep.mubr.msk.f32.mxu0 %vm50_vm0, %v24_v11 }
  0x18   :  { %2373 = vmatmul.mubr.msk.f32.gmra.mxu0 %vm50_vm0, %v25_v12 }
  0x19   :  { %2375 = vmatprep.mubr.msk.f32.mxu0 %vm50_vm0, %v26_v13 }
  0x1c   :  { %2376 = vmatmul.mubr.msk.f32.gmra.mxu0 %vm50_vm0, %v27_v14 }
  0x1d   :  { %2378 = vmatprep.mubr.msk.f32.mxu0 %vm50_vm0, %v28_v15 }
  0x20   :  { %2379 = vmatmul.mubr.msk.f32.gmra.mxu0 %vm50_vm0, %v29_v16 }
  0x21   :  { %2381 = vmatprep.mubr.msk.f32.mxu0 %vm50_vm0, %v30_v17 }
  0x24   :  { %2382 = vmatmul.mubr.msk.f32.gmra.mxu0 %vm50_vm0, %v31_v18 }
  0x25   :  { %2384 = vmatprep.mubr.msk.f32.mxu0 %vm50_vm0, %v32_v19 }
  0x28   :  { %2385 = vmatmul.mubr.msk.f32.gmra.mxu0 %vm50_vm0, %v33_v20 }
  0x29   :  { %2387 = vmatprep.mubr.msk.f32.mxu0 %vm50_vm0, %v34_v21 }
  0x2c   :  { %2388 = vmatmul.mubr.msk.f32.gmra.mxu0 %vm50_vm0, %v35_v22 }
  0x2d   :  { %2390 = vmatprep.mubr.msk.f32.mxu0 %vm50_vm0, %v36_v23 }
  0x30   :  { %2391 = vmatmul.mubr.msk.f32.gmra.mxu0 %vm50_vm0, %v37_v25 }
  0x31   :  { %2393 = vmatprep.mubr.msk.f32.mxu0 %vm50_vm0, %v38_v26 }
  0x34   :  { %2394 = vmatmul.mubr.msk.f32.gmra.mxu0 %vm50_vm0, %v39_v27 }
  0x35   :  { %2396 = vmatprep.mubr.msk.f32.mxu0 %vm50_vm0, %v40_v28 }
  0x38   :  { %2397 = vmatmul.mubr.msk.f32.gmra.mxu0 %vm50_vm0, %v41_v29 }
  0x39   :  { %2399 = vmatprep.mubr.msk.f32.mxu0 %vm50_vm0, %v42_v30 }
  0x3c   :  { %2400 = vmatmul.mubr.msk.f32.gmra.mxu0 %vm50_vm0, %v43_v31 }
  0xc4   :  { %v2359_v32 = vpop.f32.mrf.mxu0 }
  0xc5   :  { %v219_v37 = vadd.f32 %v2359_v32, %v2595_v33 }
  0xc6   :  { %v213_v34 = vpop.f32.mrf.mxu0 }
  0xc7   :  { %v214_v35 = vadd.f32 %v2595_v33, %v213_v34  ;;  %v373_v43 = vmax.f32 %v219_v37, 0.0 }
  0xc8   :  { %v2362_v36 = vpop.f32.mrf.mxu0 }
  0xc9   :  { %v372_v38 = vmax.f32 %v214_v35, 0.0  ;;  %v229_v40 = vadd.f32 %v2362_v36, %v2595_v33 }
  0xca   :  { %v223_v39 = vpop.f32.mrf.mxu0 }
  0xcb   :  { %436 = vrot.lane.b32.xlu0 %v372_v38, %s2445_s17  ;;  %v224_v41 = vadd.f32 %v2595_v33, %v223_v39  ;;  %v375_v46 = vmax.f32 %v229_v40, 0.0 }
  0xcc   :  { %v2365_v42 = vpop.f32.mrf.mxu0 }
  0xcd   :  { %v374_v44 = vmax.f32 %v224_v41, 0.0  ;;  %v239_v49 = vadd.f32 %v2365_v42, %v2595_v33 }
  0xce   :  { %v233_v45 = vpop.f32.mrf.mxu0 }
  0xcf   :  { %438 = vrot.lane.b32.xlu0 %v373_v43, %s2445_s17  ;;  %440 = vrot.lane.b32.xlu1 %v374_v44, %s2445_s17  ;;  %v234_v47 = vadd.f32 %v2595_v33, %v233_v45  ;;  %v377_v52 = vmax.f32 %v239_v49, 0.0 }
  0xd0   :  { %v2368_v48 = vpop.f32.mrf.mxu0 }
  0xd1   :  { %v376_v50 = vmax.f32 %v234_v47, 0.0  ;;  %v249_v55 = vadd.f32 %v2368_v48, %v2595_v33 }
  0xd2   :  { %v243_v51 = vpop.f32.mrf.mxu0 }
  0xd3   :  { %442 = vrot.lane.b32.xlu0 %v375_v46, %s2445_s17  ;;  %v244_v53 = vadd.f32 %v2595_v33, %v243_v51  ;;  %v379_v58 = vmax.f32 %v249_v55, 0.0 }
  0xd4   :  { %v2371_v54 = vpop.f32.mrf.mxu0 }
  0xd5   :  { %v378_v56 = vmax.f32 %v244_v53, 0.0  ;;  %v259_v61 = vadd.f32 %v2371_v54, %v2595_v33 }
  0xd6   :  { %v253_v57 = vpop.f32.mrf.mxu0 }
  0xd7   :  { %444 = vrot.lane.b32.xlu0 %v376_v50, %s2445_s17  ;;  %v254_v59 = vadd.f32 %v2595_v33, %v253_v57  ;;  %v381_v0 = vmax.f32 %v259_v61, 0.0 }
  0xd8   :  { %v2374_v60 = vpop.f32.mrf.mxu0 }
  0xd9   :  { %v380_v62 = vmax.f32 %v254_v59, 0.0  ;;  %v269_v3 = vadd.f32 %v2374_v60, %v2595_v33 }
  0xda   :  { %v263_v63 = vpop.f32.mrf.mxu0 }
  0xdb   :  { %446 = vrot.lane.b32.xlu0 %v377_v52, %s2445_s17  ;;  %v264_v1 = vadd.f32 %v2595_v33, %v263_v63  ;;  %v383_v6 = vmax.f32 %v269_v3, 0.0 }
  0xdc   :  { %v2377_v2 = vpop.f32.mrf.mxu0 }
  0xdd   :  { %v382_v4 = vmax.f32 %v264_v1, 0.0  ;;  %v279_v9 = vadd.f32 %v2377_v2, %v2595_v33 }
  0xde   :  { %v273_v5 = vpop.f32.mrf.mxu0 }
  0xdf   :  { %448 = vrot.lane.b32.xlu0 %v378_v56, %s2445_s17  ;;  %v274_v7 = vadd.f32 %v2595_v33, %v273_v5  ;;  %v385_v12 = vmax.f32 %v279_v9, 0.0 }
  0xe0   :  { %v2380_v8 = vpop.f32.mrf.mxu0 }
  0xe1   :  { %v384_v10 = vmax.f32 %v274_v7, 0.0  ;;  %v289_v15 = vadd.f32 %v2380_v8, %v2595_v33 }
  0xe2   :  { %v283_v11 = vpop.f32.mrf.mxu0 }
  0xe3   :  { %450 = vrot.lane.b32.xlu0 %v379_v58, %s2445_s17  ;;  %v284_v13 = vadd.f32 %v2595_v33, %v283_v11  ;;  %v387_v18 = vmax.f32 %v289_v15, 0.0 }
  0xe4   :  { %v2383_v14 = vpop.f32.mrf.mxu0 }
  0xe5   :  { %v386_v16 = vmax.f32 %v284_v13, 0.0  ;;  %v299_v20 = vadd.f32 %v2383_v14, %v2595_v33 }
  0xe6   :  { %v293_v17 = vpop.f32.mrf.mxu0 }
  0xe7   :  { %452 = vrot.lane.b32.xlu0 %v380_v62, %s2445_s17  ;;  %v294_v19 = vadd.f32 %v2595_v33, %v293_v17  ;;  %v389_v22 = vmax.f32 %v299_v20, 0.0 }
  0xe8   :  { %v2386_v23 = vpop.f32.mrf.mxu0 }
  0xe9   :  { %v388_v21 = vmax.f32 %v294_v19, 0.0  ;;  %v309_v26 = vadd.f32 %v2386_v23, %v2595_v33 }
  0xea   :  { %v303_v25 = vpop.f32.mrf.mxu0 }
  0xeb   :  { %454 = vrot.lane.b32.xlu0 %v381_v0, %s2445_s17  ;;  %v304_v27 = vadd.f32 %v2595_v33, %v303_v25  ;;  %v391_v30 = vmax.f32 %v309_v26, 0.0 }
  0xec   :  { %v2389_v29 = vpop.f32.mrf.mxu0 }
  0xed   :  { %v390_v28 = vmax.f32 %v304_v27, 0.0  ;;  %v319_v35 = vadd.f32 %v2389_v29, %v2595_v33 }
  0xee   :  { %v313_v31 = vpop.f32.mrf.mxu0 }
  0xef   :  { %456 = vrot.lane.b32.xlu0 %v382_v4, %s2445_s17  ;;  %v314_v32 = vadd.f32 %v2595_v33, %v313_v31  ;;  %v393_v38 = vmax.f32 %v319_v35, 0.0 }
  0xf0   :  { %v2392_v34 = vpop.f32.mrf.mxu0 }
  0xf1   :  { %v392_v36 = vmax.f32 %v314_v32, 0.0  ;;  %v329_v41 = vadd.f32 %v2392_v34, %v2595_v33 }
  0xf2   :  { %v323_v37 = vpop.f32.mrf.mxu0 }
  0xf3   :  { %458 = vrot.lane.b32.xlu0 %v383_v6, %s2445_s17  ;;  %v324_v39 = vadd.f32 %v2595_v33, %v323_v37  ;;  %v395_v44 = vmax.f32 %v329_v41, 0.0 }
  0xf4   :  { %v2395_v40 = vpop.f32.mrf.mxu0 }
  0xf5   :  { %v394_v42 = vmax.f32 %v324_v39, 0.0  ;;  %v339_v47 = vadd.f32 %v2395_v40, %v2595_v33 }
  0xf6   :  { %v333_v43 = vpop.f32.mrf.mxu0 }
  0xf7   :  { %460 = vrot.lane.b32.xlu0 %v384_v10, %s2445_s17  ;;  %v334_v45 = vadd.f32 %v2595_v33, %v333_v43  ;;  %v397_v50 = vmax.f32 %v339_v47, 0.0 }
  0xf8   :  { %v2398_v46 = vpop.f32.mrf.mxu0 }
  0xf9   :  { %v396_v48 = vmax.f32 %v334_v45, 0.0  ;;  %v349_v53 = vadd.f32 %v2398_v46, %v2595_v33 }
  0xfa   :  { %v343_v49 = vpop.f32.mrf.mxu0 }
  0xfb   :  { %462 = vrot.lane.b32.xlu0 %v385_v12, %s2445_s17  ;;  %v344_v51 = vadd.f32 %v2595_v33, %v343_v49  ;;  %v399_v56 = vmax.f32 %v349_v53, 0.0 }
  0xfc   :  { %v2401_v52 = vpop.f32.mrf.mxu0 }
  0xfd   :  { %v398_v54 = vmax.f32 %v344_v51, 0.0  ;;  %v359_v58 = vadd.f32 %v2401_v52, %v2595_v33  ;;  %v45_v51 = vld [vmem:[%s3630_s0 + $0xf8] sm:$0xff] }
  0xfe   :  { %v353_v55 = vpop.f32.mrf.mxu0 }
  0xff   :  { %464 = vrot.lane.b32.xlu0 %v386_v16, %s2445_s17  ;;  %v354_v57 = vadd.f32 %v2595_v33, %v353_v55  ;;  %v401_v60 = vmax.f32 %v359_v58, 0.0 }
 0x101   :  { %v400_v59 = vmax.f32 %v354_v57, 0.0 }
 0x103   :  { %466 = vrot.lane.b32.xlu0 %v387_v18, %s2445_s17 }
 0x107   :  { %468 = vrot.lane.b32.xlu0 %v388_v21, %s2445_s17 }
 0x10b   :  { %470 = vrot.lane.b32.xlu0 %v389_v22, %s2445_s17 }
 0x10f   :  { %472 = vrot.lane.b32.xlu0 %v390_v28, %s2445_s17 }
 0x113   :  { %474 = vrot.lane.b32.xlu0 %v391_v30, %s2445_s17 }
 0x117   :  { %476 = vrot.lane.b32.xlu0 %v392_v36, %s2445_s17 }
 0x11b   :  { %478 = vrot.lane.b32.xlu0 %v393_v38, %s2445_s17 }
 0x11f   :  { %480 = vrot.lane.b32.xlu0 %v394_v42, %s2445_s17 }
 0x123   :  { %482 = vrot.lane.b32.xlu0 %v395_v44, %s2445_s17 }
 0x127   :  { %484 = vrot.lane.b32.xlu0 %v396_v48, %s2445_s17 }
 0x12b   :  { %486 = vrot.lane.b32.xlu0 %v397_v50, %s2445_s17  ;;  %v44_v50 = vld [vmem:[%s3630_s0 + $0xf0] sm:$0xff]  ;;  %s2088_s0 = sshll.u32 %s2448_s21, 4  ;;  %s2089_s0 = int_to_ptr.vmem [resolvable:$true] %s2088_s0 }
 0x12c   :  { %2402 = vmatprep.mubr.msk.f32.mxu0 %vm50_vm0, %v44_v50  ;;  %v936_v50 = vld [vmem:[%s3631_s1 + $0x40] sm:$0xff]  ;;  %s2422_s22 = scalar_lea.vmem %s2089_s0, 16  ;;  %p2427_p1 = scmp.lt.s32.totalorder %s2089_s0, %s2089_s0 }
 0x12d   :  { %2403 = vmatmul.mubr.msk.f32.gmra.mxu0 %vm50_vm0, %v45_v51  ;;  %v935_v51 = vld [vmem:[%s3631_s1 + $0x38] sm:$0xff]  ;;  %p2423_p0 = scmp.ne.s32.totalorder %s2089_s0, %s2422_s22 }
 0x12f   :  { %488 = vrot.lane.b32.xlu0 %v398_v54, %s2445_s17 }
 0x133   :  { %490 = vrot.lane.b32.xlu0 %v399_v56, %s2445_s17 }
 0x137   :  { %492 = vrot.lane.b32.xlu0 %v400_v59, %s2445_s17 }
 0x13b   :  { %494 = vrot.lane.b32.xlu0 %v401_v60, %s2445_s17 }
 0x13d   :  { %v437_v61 = vpop.permute.xlu0 %436 }
 0x13e   :  { %533 = vst.msk [vmem:[#allocation2] sm:$0xff] %vm532_vm2, %v437_v61 }
 0x13f   :  { %566 = vst.msk [vmem:[#allocation2] sm:$0xff] %vm565_vm1, %v2444_v24 }
 0x141   :  { %v439_v62 = vpop.permute.xlu0 %438  ;;  %v441_v63 = vpop.permute.xlu1 %440 }
 0x142   :  { %534 = vst.msk [vmem:[#allocation2 + $0x10] sm:$0xff] %vm532_vm2, %v439_v62  ;;  %535 = vst.msk [vmem:[#allocation2 + $0x20] sm:$0xff] %vm532_vm2, %v441_v63 }
 0x143   :  { %567 = vst.msk [vmem:[#allocation2 + $0x10] sm:$0xff] %vm565_vm1, %v2444_v24 }
 0x145   :  { %v443_v0 = vpop.permute.xlu0 %442 }
 0x146   :  { %v2664_v1 = vld [vmem:[#allocation2] sm:$0xff]  ;;  %536 = vst.msk [vmem:[#allocation2 + $0x30] sm:$0xff] %vm532_vm2, %v443_v0 }
 0x147   :  { %574 = vrot.lane.b32.xlu1 %v2664_v1, %s2445_s17 }
 0x149   :  { %v445_v2 = vpop.permute.xlu0 %444 }
 0x14a   :  { %v2669_v3 = vld [vmem:[#allocation2 + $0x10] sm:$0xff]  ;;  %537 = vst.msk [vmem:[#allocation2 + $0x40] sm:$0xff] %vm532_vm2, %v445_v2 }
 0x14b   :  { %576 = vrot.lane.b32.xlu1 %v2669_v3, %s2445_s17 }
 0x14d   :  { %v447_v4 = vpop.permute.xlu0 %446 }
 0x14e   :  { %538 = vst.msk [vmem:[#allocation2 + $0x50] sm:$0xff] %vm532_vm2, %v447_v4 }
 0x151   :  { %v449_v5 = vpop.permute.xlu0 %448 }
 0x152   :  { %539 = vst.msk [vmem:[#allocation2 + $0x60] sm:$0xff] %vm532_vm2, %v449_v5 }
 0x155   :  { %v451_v6 = vpop.permute.xlu0 %450 }
 0x156   :  { %540 = vst.msk [vmem:[#allocation2 + $0x70] sm:$0xff] %vm532_vm2, %v451_v6 }
 0x159   :  { %v453_v7 = vpop.permute.xlu0 %452 }
 0x15a   :  { %541 = vst.msk [vmem:[#allocation2 + $0x80] sm:$0xff] %vm532_vm2, %v453_v7 }
 0x15d   :  { %v455_v8 = vpop.permute.xlu0 %454 }
 0x15e   :  { %542 = vst.msk [vmem:[#allocation2 + $0x90] sm:$0xff] %vm532_vm2, %v455_v8 }
 0x161   :  { %v457_v9 = vpop.permute.xlu0 %456 }
 0x162   :  { %543 = vst.msk [vmem:[#allocation2 + $0xa0] sm:$0xff] %vm532_vm2, %v457_v9 }
 0x165   :  { %v459_v10 = vpop.permute.xlu0 %458 }
 0x166   :  { %544 = vst.msk [vmem:[#allocation2 + $0xb0] sm:$0xff] %vm532_vm2, %v459_v10 }
 0x169   :  { %v461_v11 = vpop.permute.xlu0 %460 }
 0x16a   :  { %545 = vst.msk [vmem:[#allocation2 + $0xc0] sm:$0xff] %vm532_vm2, %v461_v11 }
 0x16d   :  { %v463_v12 = vpop.permute.xlu0 %462 }
 0x16e   :  { %546 = vst.msk [vmem:[#allocation2 + $0xd0] sm:$0xff] %vm532_vm2, %v463_v12 }
 0x171   :  { %v465_v13 = vpop.permute.xlu0 %464 }
 0x172   :  { %547 = vst.msk [vmem:[#allocation2 + $0xe0] sm:$0xff] %vm532_vm2, %v465_v13 }
 0x175   :  { %v467_v14 = vpop.permute.xlu0 %466 }
 0x176   :  { %548 = vst.msk [vmem:[#allocation2 + $0xf0] sm:$0xff] %vm532_vm2, %v467_v14 }
 0x179   :  { %v469_v15 = vpop.permute.xlu0 %468 }
 0x17a   :  { %549 = vst.msk [vmem:[#allocation2 + $0x100] sm:$0xff] %vm532_vm2, %v469_v15 }
 0x17d   :  { %v471_v16 = vpop.permute.xlu0 %470 }
 0x17e   :  { %550 = vst.msk [vmem:[#allocation2 + $0x110] sm:$0xff] %vm532_vm2, %v471_v16 }
 0x181   :  { %v473_v17 = vpop.permute.xlu0 %472 }
 0x182   :  { %551 = vst.msk [vmem:[#allocation2 + $0x120] sm:$0xff] %vm532_vm2, %v473_v17 }
 0x185   :  { %v475_v18 = vpop.permute.xlu0 %474 }
 0x186   :  { %552 = vst.msk [vmem:[#allocation2 + $0x130] sm:$0xff] %vm532_vm2, %v475_v18 }
 0x189   :  { %v477_v19 = vpop.permute.xlu0 %476 }
 0x18a   :  { %553 = vst.msk [vmem:[#allocation2 + $0x140] sm:$0xff] %vm532_vm2, %v477_v19 }
 0x18d   :  { %v479_v20 = vpop.permute.xlu0 %478 }
 0x18e   :  { %554 = vst.msk [vmem:[#allocation2 + $0x150] sm:$0xff] %vm532_vm2, %v479_v20 }
 0x191   :  { %v481_v21 = vpop.permute.xlu0 %480 }
 0x192   :  { %555 = vst.msk [vmem:[#allocation2 + $0x160] sm:$0xff] %vm532_vm2, %v481_v21 }
 0x195   :  { %v483_v22 = vpop.permute.xlu0 %482 }
 0x196   :  { %556 = vst.msk [vmem:[#allocation2 + $0x170] sm:$0xff] %vm532_vm2, %v483_v22 }
 0x199   :  { %v485_v23 = vpop.permute.xlu0 %484 }
 0x19a   :  { %557 = vst.msk [vmem:[#allocation2 + $0x180] sm:$0xff] %vm532_vm2, %v485_v23 }
 0x19d   :  { %v487_v25 = vpop.permute.xlu0 %486 }
 0x19e   :  { %558 = vst.msk [vmem:[#allocation2 + $0x190] sm:$0xff] %vm532_vm2, %v487_v25 }
 0x1a1   :  { %v489_v26 = vpop.permute.xlu0 %488 }
 0x1a2   :  { %559 = vst.msk [vmem:[#allocation2 + $0x1a0] sm:$0xff] %vm532_vm2, %v489_v26 }
 0x1a5   :  { %v491_v27 = vpop.permute.xlu0 %490 }
 0x1a6   :  { %560 = vst.msk [vmem:[#allocation2 + $0x1b0] sm:$0xff] %vm532_vm2, %v491_v27 }
 0x1a9   :  { %v493_v28 = vpop.permute.xlu0 %492 }
 0x1aa   :  { %561 = vst.msk [vmem:[#allocation2 + $0x1c0] sm:$0xff] %vm532_vm2, %v493_v28 }
 0x1ad   :  { %v495_v29 = vpop.permute.xlu0 %494 }
 0x1ae   :  { %562 = vst.msk [vmem:[#allocation2 + $0x1d0] sm:$0xff] %vm532_vm2, %v495_v29 }
 0x1b9   :  { %v575_v30 = vpop.permute.xlu1 %574 }
 0x1ba   :  { %580 = vst.msk [vmem:[#allocation2 + $0x20] sm:$0xff] %vm565_vm1, %v575_v30 }
 0x1bd   :  { %v577_v31 = vpop.permute.xlu1 %576 }
 0x1be   :  { %581 = vst.msk [vmem:[#allocation2 + $0x30] sm:$0xff] %vm565_vm1, %v577_v31 }
 0x1c1   :  { %v2701_v32 = vld [vmem:[#allocation2 + $0x20] sm:$0xff] }
 0x1c2   :  { %754 = vrot.lane.b32.xlu0 %v2701_v32, %s2445_s17  ;;  %586 = vrot.lane.b32.xlu1 %v2701_v32, %s2445_s17 }
 0x1c5   :  { %v2707_v34 = vld [vmem:[#allocation2 + $0x30] sm:$0xff] }
 0x1c6   :  { %588 = vrot.lane.b32.xlu1 %v2707_v34, %s2445_s17 }
 0x1ed   :  { %v2772_v58 = vpop.f32.mrf.mxu0 }
 0x1ef   :  { %v363_v61 = vpop.f32.mrf.mxu0 }
 0x1f0   :  { %v364_v63 = vadd.f32 %v2595_v33, %v363_v61  ;;  %v953_v61 = vld [vmem:[%s3631_s1 + $0xc8] sm:$0xff] }
 0x1f2   :  { %v402_v2 = vmax.f32 %v364_v63, 0.0  ;;  %v951_v63 = vld [vmem:[%s3631_s1 + $0xb8] sm:$0xff] }
 0x234   :  { %v587_v35 = vpop.permute.xlu1 %586  ;;  %v755_v36 = vpop.permute.xlu0 %754 }
 0x235   :  { %592 = vst.msk [vmem:[#allocation2 + $0x40] sm:$0xff] %vm565_vm1, %v587_v35  ;;  %760 = vst.msk [vmem:[#allocation2 + $0x8] sm:$0xff] %vm565_vm1, %v755_v36  ;;  %v945_v36 = vld [vmem:[%s3631_s1 + $0x88] sm:$0xff] }
 0x236   :  { %1120 = vmatpush1.msra.mxu1 %v945_v36 }
 0x237   :  { %1121 = vmatprep.subr.mxu1 %v2444_v24 }
 0x238   :  { %v589_v37 = vpop.permute.xlu1 %588 }
 0x239   :  { %593 = vst.msk [vmem:[#allocation2 + $0x50] sm:$0xff] %vm565_vm1, %v589_v37  ;;  %v944_v37 = vld [vmem:[%s3631_s1 + $0x80] sm:$0xff] }
 0x23a   :  { %1122 = vmatpush1.msra.mxu1 %v944_v37 }
 0x23b   :  { %1123 = vmatprep.subr.mxu1 %v2444_v24 }
 0x23c   :  { %v2714_v38 = vld [vmem:[#allocation2 + $0x40] sm:$0xff]  ;;  %v956_v39 = vld [vmem:[#allocation2 + $0x8] sm:$0xff] }
 0x23d   :  { %766 = vrot.lane.b32.xlu0 %v2714_v38, %s2445_s17  ;;  %598 = vrot.lane.b32.xlu1 %v2714_v38, %s2445_s17 }
 0x23e   :  { %2130 = vmatprep.mubr.msk.f32.mxu1 %vm565_vm1, %v956_v39  ;;  %v943_v39 = vld [vmem:[%s3631_s1 + $0x78] sm:$0xff] }
 0x23f   :  { %1124 = vmatpush1.msra.mxu1 %v943_v39 }
 0x240   :  { %v2721_v40 = vld [vmem:[#allocation2 + $0x50] sm:$0xff]  ;;  %1125 = vmatprep.subr.mxu1 %v2444_v24 }
 0x241   :  { %600 = vrot.lane.b32.xlu1 %v2721_v40, %s2445_s17 }
 0x2af   :  { %v599_v41 = vpop.permute.xlu1 %598  ;;  %v767_v42 = vpop.permute.xlu0 %766 }
 0x2b0   :  { %604 = vst.msk [vmem:[#allocation2 + $0x60] sm:$0xff] %vm565_vm1, %v599_v41  ;;  %772 = vst.msk [vmem:[#allocation2 + $0x28] sm:$0xff] %vm565_vm1, %v767_v42  ;;  %v942_v41 = vld [vmem:[%s3631_s1 + $0x70] sm:$0xff]  ;;  %v941_v42 = vld [vmem:[%s3631_s1 + $0x68] sm:$0xff] }
 0x2b1   :  { %1126 = vmatpush1.msra.mxu1 %v942_v41 }
 0x2b2   :  { %1127 = vmatprep.subr.mxu1 %v2444_v24 }
 0x2b3   :  { %v601_v43 = vpop.permute.xlu1 %600  ;;  %1128 = vmatpush1.msra.mxu1 %v941_v42 }
 0x2b4   :  { %605 = vst.msk [vmem:[#allocation2 + $0x70] sm:$0xff] %vm565_vm1, %v601_v43  ;;  %v940_v43 = vld [vmem:[%s3631_s1 + $0x60] sm:$0xff]  ;;  %1129 = vmatprep.subr.mxu1 %v2444_v24 }
 0x2b5   :  { %1130 = vmatpush1.msra.mxu1 %v940_v43 }
 0x2b6   :  { %1131 = vmatprep.subr.mxu1 %v2444_v24 }
 0x2b7   :  { %v2728_v44 = vld [vmem:[#allocation2 + $0x60] sm:$0xff]  ;;  %v960_v36 = vld [vmem:[#allocation2 + $0x28] sm:$0xff] }
 0x2b8   :  { %778 = vrot.lane.b32.xlu0 %v2728_v44, %s2445_s17  ;;  %610 = vrot.lane.b32.xlu1 %v2728_v44, %s2445_s17 }
 0x2bb   :  { %v2734_v45 = vld [vmem:[#allocation2 + $0x70] sm:$0xff] }
 0x2bc   :  { %612 = vrot.lane.b32.xlu1 %v2734_v45, %s2445_s17 }
 0x32a   :  { %v611_v46 = vpop.permute.xlu1 %610  ;;  %v779_v47 = vpop.permute.xlu0 %778 }
 0x32b   :  { %616 = vst.msk [vmem:[#allocation2 + $0x80] sm:$0xff] %vm565_vm1, %v611_v46  ;;  %784 = vst.msk [vmem:[#allocation2 + $0x48] sm:$0xff] %vm565_vm1, %v779_v47  ;;  %v939_v46 = vld [vmem:[%s3631_s1 + $0x58] sm:$0xff]  ;;  %v938_v47 = vld [vmem:[%s3631_s1 + $0x50] sm:$0xff] }
 0x32c   :  { %1132 = vmatpush1.msra.mxu1 %v939_v46 }
 0x32d   :  { %1133 = vmatprep.subr.mxu1 %v2444_v24 }
 0x32e   :  { %v613_v48 = vpop.permute.xlu1 %612  ;;  %1134 = vmatpush1.msra.mxu1 %v938_v47 }
 0x32f   :  { %617 = vst.msk [vmem:[#allocation2 + $0x90] sm:$0xff] %vm565_vm1, %v613_v48  ;;  %v937_v48 = vld [vmem:[%s3631_s1 + $0x48] sm:$0xff]  ;;  %1135 = vmatprep.subr.mxu1 %v2444_v24 }
 0x330   :  { %1136 = vmatpush1.msra.mxu1 %v937_v48 }
 0x331   :  { %1137 = vmatprep.subr.mxu1 %v2444_v24 }
 0x332   :  { %v2741_v49 = vld [vmem:[#allocation2 + $0x80] sm:$0xff]  ;;  %1138 = vmatpush1.msra.mxu1 %v936_v50 }
 0x333   :  { %790 = vrot.lane.b32.xlu0 %v2741_v49, %s2445_s17  ;;  %622 = vrot.lane.b32.xlu1 %v2741_v49, %s2445_s17 }
 0x334   :  { %1139 = vmatprep.subr.mxu1 %v2444_v24 }
 0x335   :  { %1140 = vmatpush1.msra.mxu1 %v935_v51 }
 0x336   :  { %v2755_v52 = vld [vmem:[#allocation2 + $0x90] sm:$0xff]  ;;  %1141 = vmatprep.subr.mxu1 %v2444_v24 }
 0x337   :  { %624 = vrot.lane.b32.xlu1 %v2755_v52, %s2445_s17 }
 0x3a5   :  { %v623_v53 = vpop.permute.xlu1 %622  ;;  %v791_v54 = vpop.permute.xlu0 %790 }
 0x3a6   :  { %628 = vst.msk [vmem:[#allocation2 + $0xa0] sm:$0xff] %vm565_vm1, %v623_v53  ;;  %796 = vst.msk [vmem:[#allocation2 + $0x68] sm:$0xff] %vm565_vm1, %v791_v54  ;;  %v934_v53 = vld [vmem:[%s3631_s1 + $0x30] sm:$0xff]  ;;  %v933_v54 = vld [vmem:[%s3631_s1 + $0x28] sm:$0xff] }
 0x3a7   :  { %1142 = vmatpush1.msra.mxu1 %v934_v53 }
 0x3a8   :  { %1143 = vmatprep.subr.mxu1 %v2444_v24 }
 0x3a9   :  { %v625_v55 = vpop.permute.xlu1 %624  ;;  %1144 = vmatpush1.msra.mxu1 %v933_v54 }
 0x3aa   :  { %629 = vst.msk [vmem:[#allocation2 + $0xb0] sm:$0xff] %vm565_vm1, %v625_v55  ;;  %v932_v55 = vld [vmem:[%s3631_s1 + $0x20] sm:$0xff]  ;;  %1145 = vmatprep.subr.mxu1 %v2444_v24 }
 0x3ab   :  { %1146 = vmatpush1.msra.mxu1 %v932_v55 }
 0x3ac   :  { %1147 = vmatprep.subr.mxu1 %v2444_v24 }
 0x3ad   :  { %v2762_v56 = vld [vmem:[#allocation2 + $0xa0] sm:$0xff] }
 0x3ae   :  { %802 = vrot.lane.b32.xlu0 %v2762_v56, %s2445_s17  ;;  %634 = vrot.lane.b32.xlu1 %v2762_v56, %s2445_s17 }
 0x3b1   :  { %v2768_v57 = vld [vmem:[#allocation2 + $0xb0] sm:$0xff] }
 0x3b2   :  { %636 = vrot.lane.b32.xlu1 %v2768_v57, %s2445_s17 }
 0x420   :  { %v635_v59 = vpop.permute.xlu1 %634  ;;  %v803_v60 = vpop.permute.xlu0 %802 }
 0x421   :  { %640 = vst.msk [vmem:[#allocation2 + $0xc0] sm:$0xff] %vm565_vm1, %v635_v59  ;;  %808 = vst.msk [vmem:[#allocation2 + $0x88] sm:$0xff] %vm565_vm1, %v803_v60  ;;  %v931_v59 = vld [vmem:[%s3631_s1 + $0x18] sm:$0xff]  ;;  %v930_v60 = vld [vmem:[%s3631_s1 + $0x10] sm:$0xff] }
 0x422   :  { %1148 = vmatpush1.msra.mxu1 %v931_v59 }
 0x423   :  { %1149 = vmatprep.subr.mxu1 %v2444_v24 }
 0x424   :  { %v637_v62 = vpop.permute.xlu1 %636  ;;  %1150 = vmatpush1.msra.mxu1 %v930_v60 }
 0x425   :  { %641 = vst.msk [vmem:[#allocation2 + $0xd0] sm:$0xff] %vm565_vm1, %v637_v62  ;;  %1167 = vmatprep.subr.mxu1 %v2444_v24  ;;  %v952_v62 = vld [vmem:[%s3631_s1 + $0xc0] sm:$0xff] }
 0x426   :  { %1168 = vmatpush2.msra.mxu1 %v953_v61 }
 0x427   :  { %1169 = vmatprep.subr.mxu1 %v2444_v24 }
 0x428   :  { %v2778_v0 = vld [vmem:[#allocation2 + $0xc0] sm:$0xff]  ;;  %1170 = vmatpush2.msra.mxu1 %v952_v62 }
 0x429   :  { %814 = vrot.lane.b32.xlu0 %v2778_v0, %s2445_s17  ;;  %646 = vrot.lane.b32.xlu1 %v2778_v0, %s2445_s17 }
 0x42a   :  { %1171 = vmatprep.subr.mxu1 %v2444_v24 }
 0x42b   :  { %1172 = vmatpush2.msra.mxu1 %v951_v63 }
 0x42c   :  { %v2784_v4 = vld [vmem:[#allocation2 + $0xd0] sm:$0xff]  ;;  %1173 = vmatprep.subr.mxu1 %v2444_v24 }
 0x42d   :  { %648 = vrot.lane.b32.xlu1 %v2784_v4, %s2445_s17  ;;  %496 = vrot.lane.b32.xlu0 %v402_v2, %s2445_s17 }
 0x49b   :  { %v647_v5 = vpop.permute.xlu1 %646  ;;  %v815_v6 = vpop.permute.xlu0 %814 }
 0x49c   :  { %652 = vst.msk [vmem:[#allocation2 + $0xe0] sm:$0xff] %vm565_vm1, %v647_v5  ;;  %820 = vst.msk [vmem:[#allocation2 + $0xa8] sm:$0xff] %vm565_vm1, %v815_v6  ;;  %v950_v5 = vld [vmem:[%s3631_s1 + $0xb0] sm:$0xff]  ;;  %v949_v6 = vld [vmem:[%s3631_s1 + $0xa8] sm:$0xff] }
 0x49d   :  { %1174 = vmatpush2.msra.mxu1 %v950_v5 }
 0x49e   :  { %1175 = vmatprep.subr.mxu1 %v2444_v24 }
 0x49f   :  { %v649_v7 = vpop.permute.xlu1 %648  ;;  %v497_v8 = vpop.permute.xlu0 %496  ;;  %1176 = vmatpush2.msra.mxu1 %v949_v6 }
 0x4a0   :  { %653 = vst.msk [vmem:[#allocation2 + $0xf0] sm:$0xff] %vm565_vm1, %v649_v7  ;;  %1177 = vmatprep.subr.mxu1 %v2444_v24 }
 0x4a1   :  { %563 = vst.msk [vmem:[#allocation2 + $0x1e0] sm:$0xff] %vm532_vm2, %v497_v8  ;;  %v948_v8 = vld [vmem:[%s3631_s1 + $0xa0] sm:$0xff] }
 0x4a2   :  { %1178 = vmatpush2.msra.mxu1 %v948_v8 }
 0x4a3   :  { %v2793_v9 = vld [vmem:[#allocation2 + $0xe0] sm:$0xff]  ;;  %1179 = vmatprep.subr.mxu1 %v2444_v24  ;;  %v976_v43 = vld [vmem:[#allocation2 + $0xa8] sm:$0xff] }
 0x4a4   :  { %826 = vrot.lane.b32.xlu0 %v2793_v9, %s2445_s17  ;;  %658 = vrot.lane.b32.xlu1 %v2793_v9, %s2445_s17 }
 0x4a7   :  { %v2799_v10 = vld [vmem:[#allocation2 + $0xf0] sm:$0xff] }
 0x4a8   :  { %660 = vrot.lane.b32.xlu1 %v2799_v10, %s2445_s17 }
 0x516   :  { %v659_v11 = vpop.permute.xlu1 %658  ;;  %v827_v12 = vpop.permute.xlu0 %826 }
 0x517   :  { %664 = vst.msk [vmem:[#allocation2 + $0x100] sm:$0xff] %vm565_vm1, %v659_v11  ;;  %832 = vst.msk [vmem:[#allocation2 + $0xc8] sm:$0xff] %vm565_vm1, %v827_v12  ;;  %v947_v11 = vld [vmem:[%s3631_s1 + $0x98] sm:$0xff] }
 0x518   :  { %1180 = vmatpush2.msra.mxu1 %v947_v11 }
 0x519   :  { %1181 = vmatprep.subr.mxu1 %v2444_v24 }
 0x51a   :  { %v661_v13 = vpop.permute.xlu1 %660 }
 0x51b   :  { %665 = vst.msk [vmem:[#allocation2 + $0x110] sm:$0xff] %vm565_vm1, %v661_v13  ;;  %v946_v13 = vld [vmem:[%s3631_s1 + $0x90] sm:$0xff] }
 0x51c   :  { %1182 = vmatpush2.msra.mxu1 %v946_v13 }
 0x51d   :  { %1184 = vmatmul.mubr.f32.vlgmr.msra.gmra.mxu1 %v2664_v1 }
 0x51e   :  { %v2806_v14 = vld [vmem:[#allocation2 + $0x100] sm:$0xff] }
 0x51f   :  { %670 = vrot.lane.b32.xlu1 %v2806_v14, %s2445_s17 }
 0x522   :  { %v2810_v15 = vld [vmem:[#allocation2 + $0x110] sm:$0xff] }
 0x523   :  { %672 = vrot.lane.b32.xlu1 %v2810_v15, %s2445_s17 }
 0x591   :  { %v671_v16 = vpop.permute.xlu1 %670 }
 0x592   :  { %676 = vst.msk [vmem:[#allocation2 + $0x120] sm:$0xff] %vm565_vm1, %v671_v16 }
 0x595   :  { %v673_v17 = vpop.permute.xlu1 %672 }
 0x596   :  { %677 = vst.msk [vmem:[#allocation2 + $0x130] sm:$0xff] %vm565_vm1, %v673_v17 }
 0x599   :  { %v2816_v18 = vld [vmem:[#allocation2 + $0x120] sm:$0xff] }
 0x59a   :  { %682 = vrot.lane.b32.xlu1 %v2816_v18, %s2445_s17 }
 0x59d   :  { %v2820_v19 = vld [vmem:[#allocation2 + $0x130] sm:$0xff] }
 0x59e   :  { %684 = vrot.lane.b32.xlu1 %v2820_v19, %s2445_s17 }
 0x60c   :  { %v683_v20 = vpop.permute.xlu1 %682 }
 0x60d   :  { %688 = vst.msk [vmem:[#allocation2 + $0x140] sm:$0xff] %vm565_vm1, %v683_v20  ;;  %v369_v20 = vadd.f32 %v2772_v58, %v2595_v33 }
 0x610   :  { %v685_v21 = vpop.permute.xlu1 %684 }
 0x611   :  { %689 = vst.msk [vmem:[#allocation2 + $0x150] sm:$0xff] %vm565_vm1, %v685_v21 }
 0x614   :  { %v2826_v22 = vld [vmem:[#allocation2 + $0x140] sm:$0xff] }
 0x615   :  { %694 = vrot.lane.b32.xlu1 %v2826_v22, %s2445_s17 }
 0x618   :  { %v2830_v23 = vld [vmem:[#allocation2 + $0x150] sm:$0xff] }
 0x619   :  { %696 = vrot.lane.b32.xlu1 %v2830_v23, %s2445_s17 }
 0x687   :  { %v695_v25 = vpop.permute.xlu1 %694 }
 0x688   :  { %700 = vst.msk [vmem:[#allocation2 + $0x160] sm:$0xff] %vm565_vm1, %v695_v25 }
 0x68b   :  { %v697_v26 = vpop.permute.xlu1 %696 }
 0x68c   :  { %701 = vst.msk [vmem:[#allocation2 + $0x170] sm:$0xff] %vm565_vm1, %v697_v26  ;;  %v403_v26 = vmax.f32 %v369_v20, 0.0 }
 0x68f   :  { %v2836_v27 = vld [vmem:[#allocation2 + $0x160] sm:$0xff] }
 0x690   :  { %706 = vrot.lane.b32.xlu1 %v2836_v27, %s2445_s17 }
 0x693   :  { %v2840_v28 = vld [vmem:[#allocation2 + $0x170] sm:$0xff] }
 0x694   :  { %708 = vrot.lane.b32.xlu1 %v2840_v28, %s2445_s17 }
 0x702   :  { %v707_v29 = vpop.permute.xlu1 %706 }
 0x703   :  { %712 = vst.msk [vmem:[#allocation2 + $0x180] sm:$0xff] %vm565_vm1, %v707_v29 }
 0x706   :  { %v709_v30 = vpop.permute.xlu1 %708 }
 0x707   :  { %713 = vst.msk [vmem:[#allocation2 + $0x190] sm:$0xff] %vm565_vm1, %v709_v30 }
 0x70a   :  { %v2846_v31 = vld [vmem:[#allocation2 + $0x180] sm:$0xff] }
 0x70b   :  { %718 = vrot.lane.b32.xlu1 %v2846_v31, %s2445_s17 }
 0x70e   :  { %v2850_v35 = vld [vmem:[#allocation2 + $0x190] sm:$0xff] }
 0x70f   :  { %720 = vrot.lane.b32.xlu1 %v2850_v35, %s2445_s17 }
 0x77d   :  { %v719_v2 = vpop.permute.xlu1 %718 }
 0x77e   :  { %724 = vst.msk [vmem:[#allocation2 + $0x1a0] sm:$0xff] %vm565_vm1, %v719_v2 }
 0x781   :  { %v721_v7 = vpop.permute.xlu1 %720 }
 0x782   :  { %725 = vst.msk [vmem:[#allocation2 + $0x1b0] sm:$0xff] %vm565_vm1, %v721_v7 }
 0x785   :  { %v2947_v12 = vld [vmem:[#allocation2 + $0x1a0] sm:$0xff] }
 0x786   :  { %730 = vrot.lane.b32.xlu1 %v2947_v12, %s2445_s17 }
 0x789   :  { %v2956_v16 = vld [vmem:[#allocation2 + $0x1b0] sm:$0xff] }
 0x78a   :  { %732 = vrot.lane.b32.xlu1 %v2956_v16, %s2445_s17 }
 0x78e   :  { %756 = vrot.lane.b32.xlu1 %v2707_v34, %s2445_s17 }
 0x792   :  { %768 = vrot.lane.b32.xlu1 %v2721_v40, %s2445_s17 }
 0x796   :  { %780 = vrot.lane.b32.xlu1 %v2734_v45, %s2445_s17 }
 0x79a   :  { %792 = vrot.lane.b32.xlu1 %v2755_v52, %s2445_s17 }
 0x79e   :  { %804 = vrot.lane.b32.xlu1 %v2768_v57, %s2445_s17 }
 0x7a2   :  { %816 = vrot.lane.b32.xlu1 %v2784_v4, %s2445_s17 }
 0x7f8   :  { %v731_v1 = vpop.permute.xlu1 %730 }
 0x7f9   :  { %736 = vst.msk [vmem:[#allocation2 + $0x1c0] sm:$0xff] %vm565_vm1, %v731_v1 }
 0x7fc   :  { %v733_v17 = vpop.permute.xlu1 %732 }
 0x7fd   :  { %737 = vst.msk [vmem:[#allocation2 + $0x1d0] sm:$0xff] %vm565_vm1, %v733_v17 }
 0x800   :  { %v757_v21 = vpop.permute.xlu1 %756  ;;  %v2976_v25 = vld [vmem:[#allocation2 + $0x1c0] sm:$0xff] }
 0x801   :  { %761 = vst.msk [vmem:[#allocation2 + $0x18] sm:$0xff] %vm565_vm1, %v757_v21  ;;  %742 = vrot.lane.b32.xlu1 %v2976_v25, %s2445_s17 }
 0x804   :  { %v769_v29 = vpop.permute.xlu1 %768  ;;  %v2981_v30 = vld [vmem:[#allocation2 + $0x1d0] sm:$0xff] }
 0x805   :  { %773 = vst.msk [vmem:[#allocation2 + $0x38] sm:$0xff] %vm565_vm1, %v769_v29  ;;  %498 = vrot.lane.b32.xlu1 %v403_v26, %s2445_s17  ;;  %744 = vrot.lane.b32.xlu0 %v2981_v30, %s2445_s17 }
 0x808   :  { %v781_v33 = vpop.permute.xlu1 %780  ;;  %v958_v58 = vld [vmem:[#allocation2 + $0x18] sm:$0xff] }
 0x809   :  { %785 = vst.msk [vmem:[#allocation2 + $0x58] sm:$0xff] %vm565_vm1, %v781_v33  ;;  %828 = vrot.lane.b32.xlu1 %v2799_v10, %s2445_s17  ;;  %838 = vrot.lane.b32.xlu0 %v2806_v14, %s2445_s17  ;;  %v1565_v33 = vld [vmem:[%s3631_s1 + $0x1c0] sm:$0xff] }
 0x80a   :  { %2131 = vmatprep.mubr.msk.f32.mxu1 %vm565_vm1, %v958_v58 }
 0x80b   :  { %1189 = vmatmul.mubr.f32.gmra.mxu1 %v2669_v3  ;;  %v964_v3 = vld [vmem:[#allocation2 + $0x48] sm:$0xff] }
 0x80c   :  { %2132 = vmatprep.mubr.msk.f32.mxu1 %vm565_vm1, %v960_v36  ;;  %v793_v37 = vpop.permute.xlu1 %792  ;;  %v962_v39 = vld [vmem:[#allocation2 + $0x38] sm:$0xff]  ;;  %v1549_v36 = vld [vmem:[%s3631_s1 + $0x140] sm:$0xff] }
 0x80d   :  { %797 = vst.msk [vmem:[#allocation2 + $0x78] sm:$0xff] %vm565_vm1, %v793_v37  ;;  %840 = vrot.lane.b32.xlu1 %v2810_v15, %s2445_s17  ;;  %850 = vrot.lane.b32.xlu0 %v2816_v18, %s2445_s17 }
 0x80f   :  { %1194 = vmatmul.mubr.f32.gmra.mxu1 %v2701_v32 }
 0x810   :  { %2133 = vmatprep.mubr.msk.f32.mxu1 %vm565_vm1, %v962_v39  ;;  %v805_v41 = vpop.permute.xlu1 %804  ;;  %v966_v32 = vld [vmem:[#allocation2 + $0x58] sm:$0xff] }
 0x811   :  { %809 = vst.msk [vmem:[#allocation2 + $0x98] sm:$0xff] %vm565_vm1, %v805_v41  ;;  %852 = vrot.lane.b32.xlu1 %v2820_v19, %s2445_s17  ;;  %862 = vrot.lane.b32.xlu0 %v2826_v22, %s2445_s17  ;;  %v1564_v39 = vld [vmem:[%s3631_s1 + $0x1b8] sm:$0xff] }
 0x813   :  { %1199 = vmatmul.mubr.f32.gmra.mxu1 %v2707_v34  ;;  %v968_v34 = vld [vmem:[#allocation2 + $0x68] sm:$0xff] }
 0x814   :  { %2134 = vmatprep.mubr.msk.f32.mxu1 %vm565_vm1, %v964_v3  ;;  %v817_v42 = vpop.permute.xlu1 %816 }
 0x815   :  { %821 = vst.msk [vmem:[#allocation2 + $0xb8] sm:$0xff] %vm565_vm1, %v817_v42  ;;  %864 = vrot.lane.b32.xlu1 %v2830_v23, %s2445_s17  ;;  %874 = vrot.lane.b32.xlu0 %v2836_v27, %s2445_s17  ;;  %v1548_v42 = vld [vmem:[%s3631_s1 + $0x138] sm:$0xff] }
 0x817   :  { %1204 = vmatmul.mubr.f32.gmra.mxu1 %v2714_v38  ;;  %v970_v38 = vld [vmem:[#allocation2 + $0x78] sm:$0xff] }
 0x818   :  { %2135 = vmatprep.mubr.msk.f32.mxu1 %vm565_vm1, %v966_v32 }
 0x819   :  { %876 = vrot.lane.b32.xlu1 %v2840_v28, %s2445_s17  ;;  %886 = vrot.lane.b32.xlu0 %v2846_v31, %s2445_s17 }
 0x81b   :  { %1209 = vmatmul.mubr.f32.gmra.mxu1 %v2721_v40  ;;  %v972_v40 = vld [vmem:[#allocation2 + $0x88] sm:$0xff] }
 0x81c   :  { %2136 = vmatprep.mubr.msk.f32.mxu1 %vm565_vm1, %v968_v34  ;;  %v978_v46 = vld [vmem:[#allocation2 + $0xb8] sm:$0xff]  ;;  %v1563_v34 = vld [vmem:[%s3631_s1 + $0x1b0] sm:$0xff] }
 0x81d   :  { %888 = vrot.lane.b32.xlu1 %v2850_v35, %s2445_s17  ;;  %898 = vrot.lane.b32.xlu0 %v2947_v12, %s2445_s17 }
 0x81f   :  { %1214 = vmatmul.mubr.f32.gmra.mxu1 %v2728_v44  ;;  %v974_v44 = vld [vmem:[#allocation2 + $0x98] sm:$0xff] }
 0x820   :  { %2137 = vmatprep.mubr.msk.f32.mxu1 %vm565_vm1, %v970_v38 }
 0x821   :  { %900 = vrot.lane.b32.xlu1 %v2956_v16, %s2445_s17  ;;  %910 = vrot.lane.b32.xlu0 %v2976_v25, %s2445_s17 }
 0x823   :  { %1219 = vmatmul.mubr.f32.gmra.mxu1 %v2734_v45  ;;  %v980_v45 = vld [vmem:[#allocation2 + $0xc8] sm:$0xff] }
 0x824   :  { %2138 = vmatprep.mubr.msk.f32.mxu1 %vm565_vm1, %v972_v40  ;;  %v1547_v40 = vld [vmem:[%s3631_s1 + $0x130] sm:$0xff] }
 0x825   :  { %912 = vrot.lane.b32.xlu1 %v2981_v30, %s2445_s17 }
 0x827   :  { %1224 = vmatmul.mubr.f32.gmra.mxu1 %v2741_v49  ;;  %v3048_v49 = vld [vmem:[%s3631_s1 + $0xd0] ss:$0 sm:$0xff] }
 0x828   :  { %2139 = vmatprep.mubr.msk.f32.mxu1 %vm565_vm1, %v974_v44 }
 0x82b   :  { %1229 = vmatmul.mubr.f32.gmra.mxu1 %v2755_v52  ;;  %v1185_v52 = vpop.f32.mrf.mxu1 }
 0x82c   :  { %2140 = vmatprep.mubr.msk.f32.mxu1 %vm565_vm1, %v976_v43  ;;  %v1186_v47 = vadd.f32 %v3048_v49, %v1185_v52  ;;  %v1562_v43 = vld [vmem:[%s3631_s1 + $0x1a8] sm:$0xff] }
 0x82d   :  { %v1187_v48 = vpop.f32.mrf.mxu1 }
 0x82f   :  { %1234 = vmatmul.mubr.f32.gmra.mxu1 %v2762_v56  ;;  %v1344_v56 = vmax.f32 %v1186_v47, 0.0  ;;  %v1561_v47 = vld [vmem:[%s3631_s1 + $0x1a0] sm:$0xff] }
 0x830   :  { %2141 = vmatprep.mubr.msk.f32.mxu1 %vm565_vm1, %v978_v46 }
 0x831   :  { %1376 = vst.msk [vmem:[#allocation3] sm:$0xff] %vm565_vm1, %v1344_v56  ;;  %v1545_v56 = vld [vmem:[%s3631_s1 + $0x120] sm:$0xff] }
 0x833   :  { %1239 = vmatmul.mubr.f32.gmra.mxu1 %v2768_v57 }
 0x834   :  { %2142 = vmatprep.mubr.msk.f32.mxu1 %vm565_vm1, %v980_v45  ;;  %v1546_v45 = vld [vmem:[%s3631_s1 + $0x128] sm:$0xff] }
 0x837   :  { %1244 = vmatmul.mubr.f32.gmra.mxu1 %v2778_v0 }
 0x838   :  { %v1408_v41 = vld [vmem:[#allocation3] sm:$0xff] }
 0x839   :  { %1410 = vst.msk [vmem:[#allocation4] sm:$0xff] %vm565_vm1, %v1408_v41 }
 0x873   :  { %v743_v50 = vpop.permute.xlu1 %742 }
 0x874   :  { %748 = vst.msk [vmem:[#allocation2 + $0x1e0] sm:$0xff] %vm565_vm1, %v743_v50 }
 0x877   :  { %v499_v57 = vpop.permute.xlu1 %498  ;;  %v745_v51 = vpop.permute.xlu0 %744 }
 0x878   :  { %564 = vst.msk [vmem:[#allocation2 + $0x1f0] sm:$0xff] %vm532_vm2, %v499_v57  ;;  %v1560_v57 = vld [vmem:[%s3631_s1 + $0x198] sm:$0xff] }
 0x879   :  { %749 = vst.msk [vmem:[#allocation2 + $0x1f0] sm:$0xff] %vm565_vm1, %v745_v51 }
 0x87b   :  { %v829_v0 = vpop.permute.xlu1 %828  ;;  %v839_v53 = vpop.permute.xlu0 %838  ;;  %v3055_v54 = vld [vmem:[#allocation2 + $0x1e0] sm:$0xff] }
 0x87c   :  { %833 = vst.msk [vmem:[#allocation2 + $0xd8] sm:$0xff] %vm565_vm1, %v829_v0  ;;  %844 = vst.msk [vmem:[#allocation2 + $0xe8] sm:$0xff] %vm565_vm1, %v839_v53  ;;  %922 = vrot.lane.b32.xlu0 %v3055_v54, %s2445_s17  ;;  %v1544_v0 = vld [vmem:[%s3631_s1 + $0x118] sm:$0xff] }
 0x87f   :  { %v841_v55 = vpop.permute.xlu1 %840  ;;  %v851_v59 = vpop.permute.xlu0 %850 }
 0x880   :  { %845 = vst.msk [vmem:[#allocation2 + $0xf8] sm:$0xff] %vm565_vm1, %v841_v55  ;;  %856 = vst.msk [vmem:[#allocation2 + $0x108] sm:$0xff] %vm565_vm1, %v851_v59  ;;  %v3063_v60 = vld [vmem:[#allocation2 + $0x1f0] sm:$0xff] }
 0x881   :  { %924 = vrot.lane.b32.xlu1 %v3063_v60, %s2445_s17  ;;  %v1559_v59 = vld [vmem:[%s3631_s1 + $0x190] sm:$0xff] }
 0x883   :  { %v853_v61 = vpop.permute.xlu1 %852  ;;  %v863_v62 = vpop.permute.xlu0 %862  ;;  %v982_v63 = vld [vmem:[#allocation2 + $0xd8] sm:$0xff]  ;;  %v984_v2 = vld [vmem:[#allocation2 + $0xe8] sm:$0xff] }
 0x884   :  { %857 = vst.msk [vmem:[#allocation2 + $0x118] sm:$0xff] %vm565_vm1, %v853_v61  ;;  %868 = vst.msk [vmem:[#allocation2 + $0x128] sm:$0xff] %vm565_vm1, %v863_v62  ;;  %2143 = vmatprep.mubr.msk.f32.mxu1 %vm565_vm1, %v982_v63  ;;  %v1543_v62 = vld [vmem:[%s3631_s1 + $0x110] sm:$0xff] }
 0x885   :  { %1249 = vmatmul.mubr.f32.gmra.mxu1 %v2784_v4 }
 0x886   :  { %2144 = vmatprep.mubr.msk.f32.mxu1 %vm565_vm1, %v984_v2  ;;  %v1558_v2 = vld [vmem:[%s3631_s1 + $0x188] sm:$0xff] }
 0x887   :  { %v865_v5 = vpop.permute.xlu1 %864  ;;  %v875_v6 = vpop.permute.xlu0 %874  ;;  %v986_v7 = vld [vmem:[#allocation2 + $0xf8] sm:$0xff]  ;;  %v988_v4 = vld [vmem:[#allocation2 + $0x108] sm:$0xff] }
 0x888   :  { %869 = vst.msk [vmem:[#allocation2 + $0x138] sm:$0xff] %vm565_vm1, %v865_v5  ;;  %880 = vst.msk [vmem:[#allocation2 + $0x148] sm:$0xff] %vm565_vm1, %v875_v6  ;;  %v1542_v6 = vld [vmem:[%s3631_s1 + $0x108] sm:$0xff] }
 0x889   :  { %1254 = vmatmul.mubr.f32.gmra.mxu1 %v2793_v9 }
 0x88a   :  { %2145 = vmatprep.mubr.msk.f32.mxu1 %vm565_vm1, %v986_v7 }
 0x88b   :  { %v877_v8 = vpop.permute.xlu1 %876  ;;  %v887_v11 = vpop.permute.xlu0 %886  ;;  %v990_v9 = vld [vmem:[#allocation2 + $0x118] sm:$0xff] }
 0x88c   :  { %881 = vst.msk [vmem:[#allocation2 + $0x158] sm:$0xff] %vm565_vm1, %v877_v8  ;;  %892 = vst.msk [vmem:[#allocation2 + $0x168] sm:$0xff] %vm565_vm1, %v887_v11  ;;  %v1557_v11 = vld [vmem:[%s3631_s1 + $0x180] sm:$0xff] }
 0x88d   :  { %1259 = vmatmul.mubr.f32.gmra.mxu1 %v2799_v10  ;;  %v992_v10 = vld [vmem:[#allocation2 + $0x128] sm:$0xff] }
 0x88e   :  { %2146 = vmatprep.mubr.msk.f32.mxu1 %vm565_vm1, %v988_v4 }
 0x88f   :  { %v889_v13 = vpop.permute.xlu1 %888  ;;  %v899_v1 = vpop.permute.xlu0 %898  ;;  %v996_v26 = vld [vmem:[#allocation2 + $0x148] sm:$0xff] }
 0x890   :  { %893 = vst.msk [vmem:[#allocation2 + $0x178] sm:$0xff] %vm565_vm1, %v889_v13  ;;  %904 = vst.msk [vmem:[#allocation2 + $0x188] sm:$0xff] %vm565_vm1, %v899_v1  ;;  %v1541_v13 = vld [vmem:[%s3631_s1 + $0x100] sm:$0xff] }
 0x891   :  { %1264 = vmatmul.mubr.f32.gmra.mxu1 %v2806_v14  ;;  %v994_v14 = vld [vmem:[#allocation2 + $0x138] sm:$0xff] }
 0x892   :  { %2147 = vmatprep.mubr.msk.f32.mxu1 %vm565_vm1, %v990_v9  ;;  %v1556_v9 = vld [vmem:[%s3631_s1 + $0x178] sm:$0xff] }
 0x893   :  { %v901_v17 = vpop.permute.xlu1 %900  ;;  %v911_v20 = vpop.permute.xlu0 %910  ;;  %v998_v29 = vld [vmem:[#allocation2 + $0x158] sm:$0xff] }
 0x894   :  { %905 = vst.msk [vmem:[#allocation2 + $0x198] sm:$0xff] %vm565_vm1, %v901_v17  ;;  %916 = vst.msk [vmem:[#allocation2 + $0x1a8] sm:$0xff] %vm565_vm1, %v911_v20  ;;  %v1540_v20 = vld [vmem:[%s3631_s1 + $0xf8] sm:$0xff] }
 0x895   :  { %1269 = vmatmul.mubr.f32.gmra.mxu1 %v2810_v15  ;;  %v1000_v15 = vld [vmem:[#allocation2 + $0x168] sm:$0xff] }
 0x896   :  { %2148 = vmatprep.mubr.msk.f32.mxu1 %vm565_vm1, %v992_v10 }
 0x897   :  { %v913_v21 = vpop.permute.xlu1 %912 }
 0x898   :  { %917 = vst.msk [vmem:[#allocation2 + $0x1b8] sm:$0xff] %vm565_vm1, %v913_v21 }
 0x899   :  { %1274 = vmatmul.mubr.f32.gmra.mxu1 %v2816_v18  ;;  %v1002_v18 = vld [vmem:[#allocation2 + $0x178] sm:$0xff] }
 0x89a   :  { %2149 = vmatprep.mubr.msk.f32.mxu1 %vm565_vm1, %v994_v14  ;;  %v1555_v14 = vld [vmem:[%s3631_s1 + $0x170] sm:$0xff] }
 0x89d   :  { %1279 = vmatmul.mubr.f32.gmra.mxu1 %v2820_v19  ;;  %v1004_v19 = vld [vmem:[#allocation2 + $0x188] sm:$0xff] }
 0x89e   :  { %2150 = vmatprep.mubr.msk.f32.mxu1 %vm565_vm1, %v996_v26 }
 0x8a1   :  { %1284 = vmatmul.mubr.f32.gmra.mxu1 %v2826_v22  ;;  %v1006_v22 = vld [vmem:[#allocation2 + $0x198] sm:$0xff] }
 0x8a2   :  { %2151 = vmatprep.mubr.msk.f32.mxu1 %vm565_vm1, %v998_v29  ;;  %v1539_v29 = vld [vmem:[%s3631_s1 + $0xf0] sm:$0xff] }
 0x8a5   :  { %1289 = vmatmul.mubr.f32.gmra.mxu1 %v2830_v23  ;;  %v1008_v23 = vld [vmem:[#allocation2 + $0x1a8] sm:$0xff] }
 0x8a6   :  { %2152 = vmatprep.mubr.msk.f32.mxu1 %vm565_vm1, %v1000_v15 }
 0x8a9   :  { %1294 = vmatmul.mubr.f32.gmra.mxu1 %v2836_v27  ;;  %v1010_v27 = vld [vmem:[#allocation2 + $0x1b8] sm:$0xff] }
 0x8aa   :  { %2153 = vmatprep.mubr.msk.f32.mxu1 %vm565_vm1, %v1002_v18  ;;  %v1554_v18 = vld [vmem:[%s3631_s1 + $0x168] sm:$0xff] }
 0x8ad   :  { %1299 = vmatmul.mubr.f32.gmra.mxu1 %v2840_v28  ;;  %v1567_v28 = vld [vmem:[%s3631_s1 + $0x1d0] sm:$0xff] }
 0x8ae   :  { %2154 = vmatprep.mubr.msk.f32.mxu1 %vm565_vm1, %v1004_v19  ;;  %2200 = vmatprep.subr.mxu0 %v1567_v28  ;;  %v1553_v28 = vld [vmem:[%s3631_s1 + $0x160] sm:$0xff] }
 0x8b1   :  { %1304 = vmatmul.mubr.f32.gmra.mxu1 %v2846_v31  ;;  %v1551_v31 = vld [vmem:[%s3631_s1 + $0x150] sm:$0xff] }
 0x8b2   :  { %2155 = vmatprep.mubr.msk.f32.mxu1 %vm565_vm1, %v1006_v22  ;;  %2201 = vmatpush3.msra.mxu0 %v1551_v31  ;;  %v1538_v22 = vld [vmem:[%s3631_s1 + $0xe8] sm:$0xff] }
 0x8b5   :  { %1309 = vmatmul.mubr.f32.gmra.mxu1 %v2850_v35  ;;  %v1566_v35 = vld [vmem:[%s3631_s1 + $0x1c8] sm:$0xff] }
 0x8b6   :  { %2156 = vmatprep.mubr.msk.f32.mxu1 %vm565_vm1, %v1008_v23  ;;  %2202 = vmatprep.subr.mxu0 %v1566_v35  ;;  %v1537_v35 = vld [vmem:[%s3631_s1 + $0xe0] sm:$0xff] }
 0x8b9   :  { %1314 = vmatmul.mubr.f32.gmra.mxu1 %v2947_v12  ;;  %v1550_v12 = vld [vmem:[%s3631_s1 + $0x148] sm:$0xff] }
 0x8ba   :  { %2157 = vmatprep.mubr.msk.f32.mxu1 %vm565_vm1, %v1010_v27  ;;  %2203 = vmatpush3.msra.mxu0 %v1550_v12 }
 0x8bb   :  { %2204 = vmatprep.subr.mxu0 %v1565_v33 }
 0x8bc   :  { %2205 = vmatpush3.msra.mxu0 %v1549_v36 }
 0x8bd   :  { %1319 = vmatmul.mubr.f32.gmra.mxu1 %v2956_v16  ;;  %2206 = vmatprep.subr.mxu0 %v1564_v39 }
 0x8be   :  { %2207 = vmatpush3.msra.mxu0 %v1548_v42 }
 0x8bf   :  { %2208 = vmatprep.subr.mxu0 %v1563_v34 }
 0x8c0   :  { %2209 = vmatpush3.msra.mxu0 %v1547_v40 }
 0x8c1   :  { %2210 = vmatprep.subr.mxu0 %v1562_v43 }
 0x8c2   :  { %2211 = vmatpush3.msra.mxu0 %v1546_v45 }
 0x8c3   :  { %2212 = vmatprep.subr.mxu0 %v1561_v47 }
 0x8c4   :  { %2213 = vmatpush3.msra.mxu0 %v1545_v56 }
 0x8c5   :  { %2214 = vmatprep.subr.mxu0 %v1560_v57 }
 0x8c6   :  { %2215 = vmatpush3.msra.mxu0 %v1544_v0 }
 0x8c7   :  { %2216 = vmatprep.subr.mxu0 %v1559_v59 }
 0x8c8   :  { %2217 = vmatpush3.msra.mxu0 %v1543_v62 }
 0x8c9   :  { %2218 = vmatprep.subr.mxu0 %v1558_v2 }
 0x8ca   :  { %2219 = vmatpush3.msra.mxu0 %v1542_v6  ;;  %v1016_v6 = vld [vmem:[#allocation2 + $0x1e8] sm:$0xff] }
 0x8cb   :  { %v1190_v16 = vpop.f32.mrf.mxu1  ;;  %2220 = vmatprep.subr.mxu0 %v1557_v11  ;;  %v1599_v11 = vld [vmem:[%s3631_s1 + $0x2d0] sm:$0xff] }
 0x8cc   :  { %v1191_v58 = vadd.f32 %v3048_v49, %v1190_v16  ;;  %2221 = vmatpush3.msra.mxu0 %v1541_v13  ;;  %v1552_v16 = vld [vmem:[%s3631_s1 + $0x158] sm:$0xff] }
 0x8cd   :  { %v1192_v37 = vpop.f32.mrf.mxu1  ;;  %2222 = vmatprep.subr.mxu0 %v1556_v9 }
 0x8ce   :  { %v1345_v3 = vmax.f32 %v1191_v58, 0.0  ;;  %2223 = vmatpush3.msra.mxu0 %v1540_v20  ;;  %v1536_v58 = vld [vmem:[%s3631_s1 + $0xd8] sm:$0xff] }
 0x8cf   :  { %v1195_v32 = vpop.f32.mrf.mxu1  ;;  %2224 = vmatprep.subr.mxu0 %v1555_v14 }
 0x8d0   :  { %1377 = vst.msk [vmem:[#allocation3 + $0x8] sm:$0xff] %vm565_vm1, %v1345_v3  ;;  %v1196_v38 = vadd.f32 %v3048_v49, %v1195_v32  ;;  %2225 = vmatpush3.msra.mxu0 %v1539_v29 }
 0x8d1   :  { %v1197_v44 = vpop.f32.mrf.mxu1  ;;  %2226 = vmatprep.subr.mxu0 %v1554_v18 }
 0x8d2   :  { %v1346_v46 = vmax.f32 %v1196_v38, 0.0  ;;  %2227 = vmatpush3.msra.mxu0 %v1538_v22 }
 0x8d3   :  { %v1200_v52 = vpop.f32.mrf.mxu1  ;;  %2228 = vmatprep.subr.mxu0 %v1553_v28 }
 0x8d4   :  { %1378 = vst.msk [vmem:[#allocation3 + $0x10] sm:$0xff] %vm565_vm1, %v1346_v46  ;;  %v1201_v48 = vadd.f32 %v3048_v49, %v1200_v52  ;;  %2229 = vmatpush3.msra.mxu0 %v1537_v35 }
 0x8d5   :  { %v1202_v50 = vpop.f32.mrf.mxu1  ;;  %2230 = vmatprep.subr.mxu0 %v1552_v16 }
 0x8d6   :  { %v1347_v51 = vmax.f32 %v1201_v48, 0.0  ;;  %2231 = vmatpush3.msra.mxu0 %v1536_v58 }
 0x8d7   :  { %v1205_v53 = vpop.f32.mrf.mxu1  ;;  %v1409_v55 = vld [vmem:[#allocation3 + $0x8] sm:$0xff]  ;;  %2238 = vmatprep.subr.mxu0 %v1599_v11  ;;  %v1580_v11 = vld [vmem:[%s3631_s1 + $0x238] sm:$0xff] }
 0x8d8   :  { %1379 = vst.msk [vmem:[#allocation3 + $0x18] sm:$0xff] %vm565_vm1, %v1347_v51  ;;  %v1206_v61 = vadd.f32 %v3048_v49, %v1205_v53  ;;  %1411 = vst.msk [vmem:[#allocation4 + $0x40] sm:$0xff] %vm565_vm1, %v1409_v55 }
 0x8d9   :  { %v1207_v63 = vpop.f32.mrf.mxu1 }
 0x8da   :  { %v1348_v5 = vmax.f32 %v1206_v61, 0.0 }
 0x8db   :  { %v1210_v7 = vpop.f32.mrf.mxu1  ;;  %v1412_v8 = vld [vmem:[#allocation3 + $0x10] sm:$0xff] }
 0x8dc   :  { %1380 = vst.msk [vmem:[#allocation3 + $0x20] sm:$0xff] %vm565_vm1, %v1348_v5  ;;  %v1211_v4 = vadd.f32 %v3048_v49, %v1210_v7  ;;  %1416 = vrot.lane.b32.xlu1 %v1412_v8, %s2445_s17  ;;  %v1018_v8 = vld [vmem:[#allocation2 + $0x1f8] sm:$0xff] }
 0x8dd   :  { %v1212_v1 = vpop.f32.mrf.mxu1 }
 0x8de   :  { %v1349_v17 = vmax.f32 %v1211_v4, 0.0 }
 0x8df   :  { %v1215_v10 = vpop.f32.mrf.mxu1  ;;  %v1413_v21 = vld [vmem:[#allocation3 + $0x18] sm:$0xff] }
 0x8e0   :  { %1381 = vst.msk [vmem:[#allocation3 + $0x28] sm:$0xff] %vm565_vm1, %v1349_v17  ;;  %v1216_v26 = vadd.f32 %v3048_v49, %v1215_v10  ;;  %1418 = vrot.lane.b32.xlu1 %v1413_v21, %s2445_s17 }
 0x8e1   :  { %v1217_v15 = vpop.f32.mrf.mxu1 }
 0x8e2   :  { %v1350_v19 = vmax.f32 %v1216_v26, 0.0 }
 0x8e3   :  { %v1220_v23 = vpop.f32.mrf.mxu1  ;;  %v1424_v27 = vld [vmem:[#allocation3 + $0x20] sm:$0xff] }
 0x8e4   :  { %1382 = vst.msk [vmem:[#allocation3 + $0x30] sm:$0xff] %vm565_vm1, %v1350_v19  ;;  %v1221_v31 = vadd.f32 %v3048_v49, %v1220_v23  ;;  %1426 = vst.msk [vmem:[#allocation4 + $0x8] sm:$0xff] %vm565_vm1, %v1424_v27 }
 0x8e5   :  { %v1222_v12 = vpop.f32.mrf.mxu1 }
 0x8e6   :  { %v1351_v33 = vmax.f32 %v1221_v31, 0.0 }
 0x8e7   :  { %v1225_v36 = vpop.f32.mrf.mxu1  ;;  %v1425_v37 = vld [vmem:[#allocation3 + $0x28] sm:$0xff] }
 0x8e8   :  { %1383 = vst.msk [vmem:[#allocation3 + $0x38] sm:$0xff] %vm565_vm1, %v1351_v33  ;;  %v1226_v39 = vadd.f32 %v3048_v49, %v1225_v36  ;;  %1427 = vst.msk [vmem:[#allocation4 + $0x48] sm:$0xff] %vm565_vm1, %v1425_v37 }
 0x8e9   :  { %v1227_v41 = vpop.f32.mrf.mxu1 }
 0x8ea   :  { %v1352_v3 = vmax.f32 %v1226_v39, 0.0 }
 0x8eb   :  { %v1230_v42 = vpop.f32.mrf.mxu1  ;;  %v1428_v32 = vld [vmem:[#allocation3 + $0x30] sm:$0xff] }
 0x8ec   :  { %1384 = vst.msk [vmem:[#allocation3 + $0x40] sm:$0xff] %vm565_vm1, %v1352_v3  ;;  %v1231_v34 = vadd.f32 %v3048_v49, %v1230_v42  ;;  %1432 = vrot.lane.b32.xlu0 %v1428_v32, %s2445_s17 }
 0x8ed   :  { %v1232_v38 = vpop.f32.mrf.mxu1 }
 0x8ee   :  { %v1353_v40 = vmax.f32 %v1231_v34, 0.0  ;;  %v923_v44 = vpop.permute.xlu0 %922 }
 0x8ef   :  { %v1235_v43 = vpop.f32.mrf.mxu1  ;;  %928 = vst.msk [vmem:[#allocation2 + $0x1c8] sm:$0xff] %vm565_vm1, %v923_v44  ;;  %v1429_v46 = vld [vmem:[#allocation3 + $0x38] sm:$0xff] }
 0x8f0   :  { %1385 = vst.msk [vmem:[#allocation3 + $0x48] sm:$0xff] %vm565_vm1, %v1353_v40  ;;  %v1236_v45 = vadd.f32 %v3048_v49, %v1235_v43  ;;  %1434 = vrot.lane.b32.xlu0 %v1429_v46, %s2445_s17 }
 0x8f1   :  { %v1237_v52 = vpop.f32.mrf.mxu1 }
 0x8f2   :  { %v1354_v47 = vmax.f32 %v1236_v45, 0.0 }
 0x8f3   :  { %v1240_v48 = vpop.f32.mrf.mxu1  ;;  %v925_v56 = vpop.permute.xlu1 %924  ;;  %v1440_v50 = vld [vmem:[#allocation3 + $0x40] sm:$0xff] }
 0x8f4   :  { %1386 = vst.msk [vmem:[#allocation3 + $0x50] sm:$0xff] %vm565_vm1, %v1354_v47  ;;  %v1241_v57 = vadd.f32 %v3048_v49, %v1240_v48  ;;  %929 = vst.msk [vmem:[#allocation2 + $0x1d8] sm:$0xff] %vm565_vm1, %v925_v56 }
 0x8f5   :  { %1442 = vst.msk [vmem:[#allocation4 + $0x10] sm:$0xff] %vm565_vm1, %v1440_v50  ;;  %v1242_v51 = vpop.f32.mrf.mxu1  ;;  %v1583_v50 = vld [vmem:[%s3631_s1 + $0x250] sm:$0xff] }
 0x8f6   :  { %v1355_v0 = vmax.f32 %v1241_v57, 0.0  ;;  %v1012_v53 = vld [vmem:[#allocation2 + $0x1c8] sm:$0xff] }
 0x8f7   :  { %v1245_v55 = vpop.f32.mrf.mxu1  ;;  %2158 = vmatprep.mubr.msk.f32.mxu1 %vm565_vm1, %v1012_v53  ;;  %v1441_v59 = vld [vmem:[#allocation3 + $0x48] sm:$0xff] }
 0x8f8   :  { %1387 = vst.msk [vmem:[#allocation3 + $0x58] sm:$0xff] %vm565_vm1, %v1355_v0  ;;  %v1246_v61 = vadd.f32 %v3048_v49, %v1245_v55  ;;  %1324 = vmatmul.mubr.f32.gmra.mxu1 %v2976_v25  ;;  %1443 = vst.msk [vmem:[#allocation4 + $0x50] sm:$0xff] %vm565_vm1, %v1441_v59  ;;  %v1598_v0 = vld [vmem:[%s3631_s1 + $0x2c8] sm:$0xff] }
 0x8f9   :  { %v1247_v62 = vpop.f32.mrf.mxu1  ;;  %v1582_v55 = vld [vmem:[%s3631_s1 + $0x248] sm:$0xff] }
 0x8fa   :  { %v1356_v63 = vmax.f32 %v1246_v61, 0.0  ;;  %v1597_v62 = vld [vmem:[%s3631_s1 + $0x2c0] sm:$0xff] }
 0x8fb   :  { %v1444_v2 = vld [vmem:[#allocation3 + $0x50] sm:$0xff]  ;;  %v1014_v5 = vld [vmem:[#allocation2 + $0x1d8] sm:$0xff] }
 0x8fc   :  { %1388 = vst.msk [vmem:[#allocation3 + $0x60] sm:$0xff] %vm565_vm1, %v1356_v63  ;;  %1448 = vrot.lane.b32.xlu1 %v1444_v2, %s2445_s17  ;;  %2159 = vmatprep.mubr.msk.f32.mxu1 %vm565_vm1, %v1014_v5  ;;  %v1581_v5 = vld [vmem:[%s3631_s1 + $0x240] sm:$0xff] }
 0x8fd   :  { %1329 = vmatmul.mubr.f32.gmra.mxu1 %v2981_v30 }
 0x8fe   :  { %2160 = vmatprep.mubr.msk.f32.mxu1 %vm565_vm1, %v1016_v6 }
 0x8ff   :  { %v1445_v7 = vld [vmem:[#allocation3 + $0x58] sm:$0xff] }
 0x900   :  { %1450 = vrot.lane.b32.xlu1 %v1445_v7, %s2445_s17 }
 0x901   :  { %1334 = vmatmul.mubr.f32.gmra.mxu1 %v3055_v54 }
 0x902   :  { %2161 = vmatprep.mubr.msk.f32.mxu1 %vm565_vm1, %v1018_v8  ;;  %v1596_v8 = vld [vmem:[%s3631_s1 + $0x2b8] sm:$0xff] }
 0x903   :  { %v1456_v25 = vld [vmem:[#allocation3 + $0x60] sm:$0xff] }
 0x904   :  { %1458 = vst.msk [vmem:[#allocation4 + $0x18] sm:$0xff] %vm565_vm1, %v1456_v25 }
 0x905   :  { %1339 = vmatmul.mubr.f32.gmra.mxu1 %v3063_v60 }
 0x945   :  { %v1250_v30 = vpop.f32.mrf.mxu1 }
 0x946   :  { %v1251_v4 = vadd.f32 %v3048_v49, %v1250_v30 }
 0x947   :  { %v1252_v13 = vpop.f32.mrf.mxu1 }
 0x948   :  { %v1357_v1 = vmax.f32 %v1251_v4, 0.0  ;;  %v1595_v4 = vld [vmem:[%s3631_s1 + $0x2b0] sm:$0xff] }
 0x949   :  { %v1255_v9 = vpop.f32.mrf.mxu1 }
 0x94a   :  { %1389 = vst.msk [vmem:[#allocation3 + $0x68] sm:$0xff] %vm565_vm1, %v1357_v1  ;;  %v1256_v54 = vadd.f32 %v3048_v49, %v1255_v9 }
 0x94b   :  { %v1257_v17 = vpop.f32.mrf.mxu1 }
 0x94c   :  { %v1358_v20 = vmax.f32 %v1256_v54, 0.0  ;;  %v1579_v54 = vld [vmem:[%s3631_s1 + $0x230] sm:$0xff] }
 0x94d   :  { %v1260_v10 = vpop.f32.mrf.mxu1 }
 0x94e   :  { %1390 = vst.msk [vmem:[#allocation3 + $0x70] sm:$0xff] %vm565_vm1, %v1358_v20  ;;  %v1417_v60 = vpop.permute.xlu1 %1416  ;;  %v1261_v21 = vadd.f32 %v3048_v49, %v1260_v10  ;;  %v1594_v20 = vld [vmem:[%s3631_s1 + $0x2a8] sm:$0xff] }
 0x94f   :  { %1422 = vst.msk [vmem:[#allocation4] sm:$0xff] %vm532_vm2, %v1417_v60  ;;  %v1262_v14 = vpop.f32.mrf.mxu1  ;;  %v1578_v60 = vld [vmem:[%s3631_s1 + $0x228] sm:$0xff] }
 0x950   :  { %v1359_v26 = vmax.f32 %v1261_v21, 0.0  ;;  %v1593_v14 = vld [vmem:[%s3631_s1 + $0x2a0] sm:$0xff] }
 0x951   :  { %v1265_v29 = vpop.f32.mrf.mxu1  ;;  %v1457_v15 = vld [vmem:[#allocation3 + $0x68] sm:$0xff] }
 0x952   :  { %1391 = vst.msk [vmem:[#allocation3 + $0x78] sm:$0xff] %vm565_vm1, %v1359_v26  ;;  %v1419_v18 = vpop.permute.xlu1 %1418  ;;  %v1266_v19 = vadd.f32 %v3048_v49, %v1265_v29  ;;  %1459 = vst.msk [vmem:[#allocation4 + $0x58] sm:$0xff] %vm565_vm1, %v1457_v15 }
 0x953   :  { %1423 = vst.msk [vmem:[#allocation4 + $0x40] sm:$0xff] %vm532_vm2, %v1419_v18  ;;  %v1267_v22 = vpop.f32.mrf.mxu1  ;;  %v1577_v18 = vld [vmem:[%s3631_s1 + $0x220] sm:$0xff] }
 0x954   :  { %v1360_v23 = vmax.f32 %v1266_v19, 0.0  ;;  %v1592_v22 = vld [vmem:[%s3631_s1 + $0x298] sm:$0xff] }
 0x955   :  { %v1270_v27 = vpop.f32.mrf.mxu1  ;;  %v1460_v28 = vld [vmem:[#allocation3 + $0x70] sm:$0xff] }
 0x956   :  { %1392 = vst.msk [vmem:[#allocation3 + $0x80] sm:$0xff] %vm565_vm1, %v1360_v23  ;;  %v1271_v31 = vadd.f32 %v3048_v49, %v1270_v27  ;;  %1464 = vrot.lane.b32.xlu0 %v1460_v28, %s2445_s17  ;;  %v1665_v51 = vld [vmem:[#allocation4] sm:$0xff]  ;;  %v1576_v27 = vld [vmem:[%s3631_s1 + $0x218] sm:$0xff] }
 0x957   :  { %v1272_v35 = vpop.f32.mrf.mxu1 }
 0x958   :  { %v1361_v12 = vmax.f32 %v1271_v31, 0.0  ;;  %v1591_v35 = vld [vmem:[%s3631_s1 + $0x290] sm:$0xff] }
 0x959   :  { %v1275_v16 = vpop.f32.mrf.mxu1  ;;  %v1461_v33 = vld [vmem:[#allocation3 + $0x78] sm:$0xff] }
 0x95a   :  { %1393 = vst.msk [vmem:[#allocation3 + $0x88] sm:$0xff] %vm565_vm1, %v1361_v12  ;;  %v1276_v58 = vadd.f32 %v3048_v49, %v1275_v16  ;;  %1466 = vrot.lane.b32.xlu0 %v1461_v33, %s2445_s17  ;;  %v1673_v7 = vld [vmem:[#allocation4 + $0x40] sm:$0xff]  ;;  %v1575_v16 = vld [vmem:[%s3631_s1 + $0x210] sm:$0xff] }
 0x95b   :  { %v1277_v36 = vpop.f32.mrf.mxu1 }
 0x95c   :  { %v1362_v37 = vmax.f32 %v1276_v58, 0.0  ;;  %v1590_v58 = vld [vmem:[%s3631_s1 + $0x288] sm:$0xff] }
 0x95d   :  { %v1280_v39 = vpop.f32.mrf.mxu1  ;;  %v1472_v41 = vld [vmem:[#allocation3 + $0x80] sm:$0xff] }
 0x95e   :  { %1394 = vst.msk [vmem:[#allocation3 + $0x90] sm:$0xff] %vm565_vm1, %v1362_v37  ;;  %v1281_v3 = vadd.f32 %v3048_v49, %v1280_v39  ;;  %v1433_v42 = vpop.permute.xlu0 %1432  ;;  %1474 = vst.msk [vmem:[#allocation4 + $0x20] sm:$0xff] %vm565_vm1, %v1472_v41  ;;  %v1574_v37 = vld [vmem:[%s3631_s1 + $0x208] sm:$0xff] }
 0x95f   :  { %1438 = vst.msk [vmem:[#allocation4 + $0x8] sm:$0xff] %vm532_vm2, %v1433_v42  ;;  %v1282_v32 = vpop.f32.mrf.mxu1 }
 0x960   :  { %v1363_v34 = vmax.f32 %v1281_v3, 0.0  ;;  %v1589_v3 = vld [vmem:[%s3631_s1 + $0x280] sm:$0xff] }
 0x961   :  { %v1285_v38 = vpop.f32.mrf.mxu1  ;;  %v1473_v40 = vld [vmem:[#allocation3 + $0x88] sm:$0xff]  ;;  %v1573_v32 = vld [vmem:[%s3631_s1 + $0x200] sm:$0xff] }
 0x962   :  { %1395 = vst.msk [vmem:[#allocation3 + $0x98] sm:$0xff] %vm565_vm1, %v1363_v34  ;;  %v1286_v44 = vadd.f32 %v3048_v49, %v1285_v38  ;;  %v1435_v43 = vpop.permute.xlu0 %1434  ;;  %1475 = vst.msk [vmem:[#allocation4 + $0x60] sm:$0xff] %vm565_vm1, %v1473_v40  ;;  %v1588_v38 = vld [vmem:[%s3631_s1 + $0x278] sm:$0xff] }
 0x963   :  { %1439 = vst.msk [vmem:[#allocation4 + $0x48] sm:$0xff] %vm532_vm2, %v1435_v43  ;;  %v1287_v46 = vpop.f32.mrf.mxu1 }
 0x964   :  { %v1364_v45 = vmax.f32 %v1286_v44, 0.0  ;;  %v1572_v44 = vld [vmem:[%s3631_s1 + $0x1f8] sm:$0xff]  ;;  %v1587_v46 = vld [vmem:[%s3631_s1 + $0x270] sm:$0xff] }
 0x965   :  { %v1290_v52 = vpop.f32.mrf.mxu1  ;;  %v1476_v47 = vld [vmem:[#allocation3 + $0x90] sm:$0xff] }
 0x966   :  { %1396 = vst.msk [vmem:[#allocation3 + $0xa0] sm:$0xff] %vm565_vm1, %v1364_v45  ;;  %v1291_v48 = vadd.f32 %v3048_v49, %v1290_v52  ;;  %1480 = vrot.lane.b32.xlu1 %v1476_v47, %s2445_s17  ;;  %v1666_v56 = vld [vmem:[#allocation4 + $0x8] sm:$0xff]  ;;  %v1571_v47 = vld [vmem:[%s3631_s1 + $0x1f0] sm:$0xff] }
 0x967   :  { %1749 = vmatprep.mubr.f32.mxu0 %v1666_v56  ;;  %v1292_v57 = vpop.f32.mrf.mxu1  ;;  %v1586_v56 = vld [vmem:[%s3631_s1 + $0x268] sm:$0xff] }
 0x968   :  { %v1365_v53 = vmax.f32 %v1291_v48, 0.0  ;;  %1750 = vmatmul.mubr.f32.vlgmr.msra.gmra.mxu0 %v1665_v51  ;;  %v1570_v57 = vld [vmem:[%s3631_s1 + $0x1e8] sm:$0xff]  ;;  %v1585_v51 = vld [vmem:[%s3631_s1 + $0x260] sm:$0xff] }
 0x969   :  { %v1295_v59 = vpop.f32.mrf.mxu1  ;;  %v1477_v61 = vld [vmem:[#allocation3 + $0x98] sm:$0xff]  ;;  %2239 = vmatpush3.msra.mxu0 %v1583_v50 }
 0x96a   :  { %1397 = vst.msk [vmem:[#allocation3 + $0xa8] sm:$0xff] %vm565_vm1, %v1365_v53  ;;  %v1296_v63 = vadd.f32 %v3048_v49, %v1295_v59  ;;  %1482 = vrot.lane.b32.xlu1 %v1477_v61, %s2445_s17  ;;  %v1674_v2 = vld [vmem:[#allocation4 + $0x48] sm:$0xff]  ;;  %2240 = vmatprep.subr.mxu0 %v1598_v0  ;;  %v1569_v53 = vld [vmem:[%s3631_s1 + $0x1e0] sm:$0xff]  ;;  %v1568_v59 = vld [vmem:[%s3631_s1 + $0x1d8] sm:$0xff] }
 0x96b   :  { %1754 = vmatprep.mubr.f32.mxu0 %v1674_v2  ;;  %v1297_v6 = vpop.f32.mrf.mxu1  ;;  %2241 = vmatpush3.msra.mxu0 %v1582_v55  ;;  %v1584_v55 = vld [vmem:[%s3631_s1 + $0x258] sm:$0xff] }
 0x96c   :  { %v1366_v25 = vmax.f32 %v1296_v63, 0.0  ;;  %1755 = vmatmul.mubr.f32.gmra.mxu0 %v1673_v7  ;;  %2242 = vmatprep.subr.mxu0 %v1597_v62  ;;  %v1631_v62 = vld [vmem:[%s3631_s1 + $0x3d0] sm:$0xff] }
 0x96d   :  { %v1300_v30 = vpop.f32.mrf.mxu1  ;;  %2243 = vmatpush3.msra.mxu0 %v1581_v5  ;;  %v1488_v13 = vld [vmem:[#allocation3 + $0xa0] sm:$0xff] }
 0x96e   :  { %1398 = vst.msk [vmem:[#allocation3 + $0xb0] sm:$0xff] %vm565_vm1, %v1366_v25  ;;  %v1449_v1 = vpop.permute.xlu1 %1448  ;;  %v1301_v9 = vadd.f32 %v3048_v49, %v1300_v30  ;;  %2244 = vmatprep.subr.mxu0 %v1596_v8  ;;  %1490 = vst.msk [vmem:[#allocation4 + $0x28] sm:$0xff] %vm565_vm1, %v1488_v13 }
 0x96f   :  { %1454 = vst.msk [vmem:[#allocation4 + $0x10] sm:$0xff] %vm532_vm2, %v1449_v1  ;;  %v1302_v17 = vpop.f32.mrf.mxu1  ;;  %2245 = vmatpush3.msra.mxu0 %v1580_v11 }
 0x970   :  { %v1367_v10 = vmax.f32 %v1301_v9, 0.0  ;;  %2246 = vmatprep.subr.mxu0 %v1595_v4 }
 0x971   :  { %v1305_v21 = vpop.f32.mrf.mxu1  ;;  %2247 = vmatpush3.msra.mxu0 %v1579_v54  ;;  %v1489_v26 = vld [vmem:[#allocation3 + $0xa8] sm:$0xff] }
 0x972   :  { %1399 = vst.msk [vmem:[#allocation3 + $0xb8] sm:$0xff] %vm565_vm1, %v1367_v10  ;;  %v1451_v29 = vpop.permute.xlu1 %1450  ;;  %v1306_v15 = vadd.f32 %v3048_v49, %v1305_v21  ;;  %2248 = vmatprep.subr.mxu0 %v1594_v20  ;;  %1491 = vst.msk [vmem:[#allocation4 + $0x68] sm:$0xff] %vm565_vm1, %v1489_v26 }
 0x973   :  { %1455 = vst.msk [vmem:[#allocation4 + $0x50] sm:$0xff] %vm532_vm2, %v1451_v29  ;;  %v1307_v19 = vpop.f32.mrf.mxu1  ;;  %2249 = vmatpush3.msra.mxu0 %v1578_v60 }
 0x974   :  { %v1368_v23 = vmax.f32 %v1306_v15, 0.0  ;;  %2250 = vmatprep.subr.mxu0 %v1593_v14 }
 0x975   :  { %v1310_v28 = vpop.f32.mrf.mxu1  ;;  %v1492_v31 = vld [vmem:[#allocation3 + $0xb0] sm:$0xff]  ;;  %2251 = vmatpush3.msra.mxu0 %v1577_v18 }
 0x976   :  { %1400 = vst.msk [vmem:[#allocation3 + $0xc0] sm:$0xff] %vm565_vm1, %v1368_v23  ;;  %v1311_v12 = vadd.f32 %v3048_v49, %v1310_v28  ;;  %1496 = vrot.lane.b32.xlu0 %v1492_v31, %s2445_s17  ;;  %2252 = vmatprep.subr.mxu0 %v1592_v22  ;;  %v1667_v19 = vld [vmem:[#allocation4 + $0x10] sm:$0xff]  ;;  %v1630_v22 = vld [vmem:[%s3631_s1 + $0x3c8] sm:$0xff]  ;;  %v1613_v31 = vld [vmem:[%s3631_s1 + $0x340] sm:$0xff] }
 0x977   :  { %v1312_v33 = vpop.f32.mrf.mxu1  ;;  %2253 = vmatpush3.msra.mxu0 %v1576_v27  ;;  %v1614_v23 = vld [vmem:[%s3631_s1 + $0x348] sm:$0xff]  ;;  %v1629_v27 = vld [vmem:[%s3631_s1 + $0x3c0] sm:$0xff] }
 0x978   :  { %v1369_v36 = vmax.f32 %v1311_v12, 0.0  ;;  %2254 = vmatprep.subr.mxu0 %v1591_v35  ;;  %v1628_v12 = vld [vmem:[%s3631_s1 + $0x3b8] sm:$0xff]  ;;  %v1627_v33 = vld [vmem:[%s3631_s1 + $0x3b0] sm:$0xff] }
 0x979   :  { %v1315_v39 = vpop.f32.mrf.mxu1  ;;  %v1493_v41 = vld [vmem:[#allocation3 + $0xb8] sm:$0xff]  ;;  %2255 = vmatpush3.msra.mxu0 %v1575_v16 }
 0x97a   :  { %1401 = vst.msk [vmem:[#allocation3 + $0xc8] sm:$0xff] %vm565_vm1, %v1369_v36  ;;  %v1316_v42 = vadd.f32 %v3048_v49, %v1315_v39  ;;  %1498 = vrot.lane.b32.xlu0 %v1493_v41, %s2445_s17  ;;  %2256 = vmatprep.subr.mxu0 %v1590_v58  ;;  %v1675_v35 = vld [vmem:[#allocation4 + $0x50] sm:$0xff]  ;;  %v1612_v16 = vld [vmem:[%s3631_s1 + $0x338] sm:$0xff]  ;;  %v1610_v39 = vld [vmem:[%s3631_s1 + $0x328] sm:$0xff] }
 0x97b   :  { %v1317_v34 = vpop.f32.mrf.mxu1  ;;  %2257 = vmatpush3.msra.mxu0 %v1574_v37  ;;  %v1611_v36 = vld [vmem:[%s3631_s1 + $0x330] sm:$0xff]  ;;  %v1626_v37 = vld [vmem:[%s3631_s1 + $0x3a8] sm:$0xff]  ;;  %v1625_v41 = vld [vmem:[%s3631_s1 + $0x3a0] sm:$0xff] }
 0x97c   :  { %v1370_v40 = vmax.f32 %v1316_v42, 0.0  ;;  %2258 = vmatprep.subr.mxu0 %v1589_v3  ;;  %v1609_v42 = vld [vmem:[%s3631_s1 + $0x320] sm:$0xff]  ;;  %v1608_v34 = vld [vmem:[%s3631_s1 + $0x318] sm:$0xff] }
 0x97d   :  { %v1320_v43 = vpop.f32.mrf.mxu1  ;;  %2259 = vmatpush3.msra.mxu0 %v1573_v32  ;;  %v1504_v45 = vld [vmem:[#allocation3 + $0xc0] sm:$0xff]  ;;  %v1624_v32 = vld [vmem:[%s3631_s1 + $0x398] sm:$0xff] }
 0x97e   :  { %1402 = vst.msk [vmem:[#allocation3 + $0xd0] sm:$0xff] %vm565_vm1, %v1370_v40  ;;  %v1321_v52 = vadd.f32 %v3048_v49, %v1320_v43  ;;  %2260 = vmatprep.subr.mxu0 %v1588_v38  ;;  %1506 = vst.msk [vmem:[#allocation4 + $0x30] sm:$0xff] %vm565_vm1, %v1504_v45  ;;  %v1623_v38 = vld [vmem:[%s3631_s1 + $0x390] sm:$0xff]  ;;  %v1606_v43 = vld [vmem:[%s3631_s1 + $0x308] sm:$0xff] }
 0x97f   :  { %v1322_v48 = vpop.f32.mrf.mxu1  ;;  %2261 = vmatpush3.msra.mxu0 %v1572_v44  ;;  %v1607_v40 = vld [vmem:[%s3631_s1 + $0x310] sm:$0xff]  ;;  %v1622_v44 = vld [vmem:[%s3631_s1 + $0x388] sm:$0xff]  ;;  %v1605_v45 = vld [vmem:[%s3631_s1 + $0x300] sm:$0xff] }
 0x980   :  { %v1371_v50 = vmax.f32 %v1321_v52, 0.0  ;;  %2262 = vmatprep.subr.mxu0 %v1587_v46  ;;  %v1621_v46 = vld [vmem:[%s3631_s1 + $0x380] sm:$0xff]  ;;  %v1620_v52 = vld [vmem:[%s3631_s1 + $0x378] sm:$0xff]  ;;  %v1619_v48 = vld [vmem:[%s3631_s1 + $0x370] sm:$0xff] }
 0x981   :  { %2263 = vmatpush3.msra.mxu0 %v1571_v47  ;;  %v1505_v0 = vld [vmem:[#allocation3 + $0xc8] sm:$0xff]  ;;  %v1604_v47 = vld [vmem:[%s3631_s1 + $0x2f8] sm:$0xff] }
 0x982   :  { %1403 = vst.msk [vmem:[#allocation3 + $0xd8] sm:$0xff] %vm565_vm1, %v1371_v50  ;;  %2264 = vmatprep.subr.mxu0 %v1586_v56  ;;  %1507 = vst.msk [vmem:[#allocation4 + $0x70] sm:$0xff] %vm565_vm1, %v1505_v0  ;;  %v1603_v50 = vld [vmem:[%s3631_s1 + $0x2f0] sm:$0xff]  ;;  %v1617_v0 = vld [vmem:[%s3631_s1 + $0x360] sm:$0xff] }
 0x983   :  { %2265 = vmatpush3.msra.mxu0 %v1570_v57  ;;  %v1618_v57 = vld [vmem:[%s3631_s1 + $0x368] sm:$0xff] }
 0x984   :  { %2266 = vmatprep.subr.mxu0 %v1585_v51  ;;  %v1602_v51 = vld [vmem:[%s3631_s1 + $0x2e8] sm:$0xff] }
 0x985   :  { %v1508_v61 = vld [vmem:[#allocation3 + $0xd0] sm:$0xff]  ;;  %2267 = vmatpush3.msra.mxu0 %v1569_v53 }
 0x986   :  { %1512 = vrot.lane.b32.xlu1 %v1508_v61, %s2445_s17  ;;  %2268 = vmatprep.subr.mxu0 %v1584_v55  ;;  %v1601_v55 = vld [vmem:[%s3631_s1 + $0x2e0] sm:$0xff]  ;;  %v1600_v61 = vld [vmem:[%s3631_s1 + $0x2d8] sm:$0xff] }
 0x987   :  { %2269 = vmatpush3.msra.mxu0 %v1568_v59  ;;  %v1616_v59 = vld [vmem:[%s3631_s1 + $0x358] sm:$0xff] }
 0x988   :  { %2276 = vmatprep.subr.mxu0 %v1631_v62  ;;  %v1663_v62 = vld [vmem:[%s3631_s1 + $0x4d0] sm:$0xff] }
 0x989   :  { %v1509_v63 = vld [vmem:[#allocation3 + $0xd8] sm:$0xff] }
 0x98a   :  { %1514 = vrot.lane.b32.xlu1 %v1509_v63, %s2445_s17 }
 0x9b8   :  { %v1325_v2 = vpop.f32.mrf.mxu1 }
 0x9b9   :  { %v1326_v5 = vadd.f32 %v3048_v49, %v1325_v2  ;;  %v1647_v2 = vld [vmem:[%s3631_s1 + $0x450] sm:$0xff] }
 0x9ba   :  { %v1327_v6 = vpop.f32.mrf.mxu1 }
 0x9bb   :  { %v1372_v7 = vmax.f32 %v1326_v5, 0.0  ;;  %v1662_v6 = vld [vmem:[%s3631_s1 + $0x4c8] sm:$0xff] }
 0x9bd   :  { %1404 = vst.msk [vmem:[#allocation3 + $0xe0] sm:$0xff] %vm565_vm1, %v1372_v7  ;;  %v1330_v8 = vpop.f32.mrf.mxu1  ;;  %v1646_v7 = vld [vmem:[%s3631_s1 + $0x448] sm:$0xff] }
 0x9be   :  { %v1331_v25 = vadd.f32 %v3048_v49, %v1330_v8  ;;  %v1661_v8 = vld [vmem:[%s3631_s1 + $0x4c0] sm:$0xff] }
 0x9bf   :  { %v1332_v11 = vpop.f32.mrf.mxu1 }
 0x9c0   :  { %v1373_v30 = vmax.f32 %v1331_v25, 0.0  ;;  %v1645_v11 = vld [vmem:[%s3631_s1 + $0x440] sm:$0xff] }
 0x9c1   :  { %v1335_v4 = vpop.f32.mrf.mxu1 }
 0x9c2   :  { %1405 = vst.msk [vmem:[#allocation3 + $0xe8] sm:$0xff] %vm565_vm1, %v1373_v30  ;;  %v1336_v13 = vadd.f32 %v3048_v49, %v1335_v4  ;;  %v1660_v4 = vld [vmem:[%s3631_s1 + $0x4b8] sm:$0xff] }
 0x9c3   :  { %v1337_v1 = vpop.f32.mrf.mxu1 }
 0x9c4   :  { %v1374_v9 = vmax.f32 %v1336_v13, 0.0  ;;  %v1520_v54 = vld [vmem:[#allocation3 + $0xe0] sm:$0xff]  ;;  %v1644_v13 = vld [vmem:[%s3631_s1 + $0x438] sm:$0xff]  ;;  %v1659_v1 = vld [vmem:[%s3631_s1 + $0x4b0] sm:$0xff] }
 0x9c5   :  { %v1340_v17 = vpop.f32.mrf.mxu1  ;;  %1522 = vst.msk [vmem:[#allocation4 + $0x38] sm:$0xff] %vm565_vm1, %v1520_v54  ;;  %v1643_v54 = vld [vmem:[%s3631_s1 + $0x430] sm:$0xff] }
 0x9c6   :  { %1406 = vst.msk [vmem:[#allocation3 + $0xf0] sm:$0xff] %vm565_vm1, %v1374_v9  ;;  %v1341_v20 = vadd.f32 %v3048_v49, %v1340_v17  ;;  %v1615_v49 = vld [vmem:[%s3631_s1 + $0x350] sm:$0xff]  ;;  %v1658_v17 = vld [vmem:[%s3631_s1 + $0x4a8] sm:$0xff] }
 0x9c7   :  { %v1342_v10 = vpop.f32.mrf.mxu1 }
 0x9c8   :  { %v1375_v60 = vmax.f32 %v1341_v20, 0.0  ;;  %v1465_v21 = vpop.permute.xlu0 %1464  ;;  %v1642_v20 = vld [vmem:[%s3631_s1 + $0x428] sm:$0xff]  ;;  %v1657_v10 = vld [vmem:[%s3631_s1 + $0x4a0] sm:$0xff] }
 0x9c9   :  { %1470 = vst.msk [vmem:[#allocation4 + $0x18] sm:$0xff] %vm532_vm2, %v1465_v21  ;;  %v1521_v14 = vld [vmem:[#allocation3 + $0xe8] sm:$0xff]  ;;  %v1641_v21 = vld [vmem:[%s3631_s1 + $0x420] sm:$0xff] }
 0x9ca   :  { %1407 = vst.msk [vmem:[#allocation3 + $0xf8] sm:$0xff] %vm565_vm1, %v1375_v60  ;;  %1523 = vst.msk [vmem:[#allocation4 + $0x78] sm:$0xff] %vm565_vm1, %v1521_v14  ;;  %v1656_v14 = vld [vmem:[%s3631_s1 + $0x498] sm:$0xff] }
 0x9cc   :  { %v1467_v26 = vpop.permute.xlu0 %1466 }
 0x9cd   :  { %1471 = vst.msk [vmem:[#allocation4 + $0x58] sm:$0xff] %vm532_vm2, %v1467_v26  ;;  %v1524_v29 = vld [vmem:[#allocation3 + $0xf0] sm:$0xff]  ;;  %v1640_v26 = vld [vmem:[%s3631_s1 + $0x418] sm:$0xff] }
 0x9ce   :  { %1528 = vrot.lane.b32.xlu0 %v1524_v29, %s2445_s17  ;;  %v1655_v29 = vld [vmem:[%s3631_s1 + $0x490] sm:$0xff] }
 0x9d0   :  { %v1668_v15 = vld [vmem:[#allocation4 + $0x18] sm:$0xff] }
 0x9d1   :  { %1824 = vmatprep.mubr.f32.mxu0 %v1668_v15  ;;  %v1525_v18 = vld [vmem:[#allocation3 + $0xf8] sm:$0xff]  ;;  %v1639_v15 = vld [vmem:[%s3631_s1 + $0x410] sm:$0xff] }
 0x9d2   :  { %1530 = vrot.lane.b32.xlu0 %v1525_v18, %s2445_s17  ;;  %1825 = vmatmul.mubr.f32.vlgmr.msra.gmra.mxu0 %v1667_v19  ;;  %v1638_v18 = vld [vmem:[%s3631_s1 + $0x408] sm:$0xff]  ;;  %v1653_v19 = vld [vmem:[%s3631_s1 + $0x480] sm:$0xff] }
 0x9d3   :  { %2277 = vmatpush3.msra.mxu0 %v1615_v49  ;;  %v1654_v49 = vld [vmem:[%s3631_s1 + $0x488] sm:$0xff] }
 0x9d4   :  { %2278 = vmatprep.subr.mxu0 %v1630_v22  ;;  %v1676_v28 = vld [vmem:[#allocation4 + $0x58] sm:$0xff]  ;;  %v1637_v22 = vld [vmem:[%s3631_s1 + $0x400] sm:$0xff] }
 0x9d5   :  { %1829 = vmatprep.mubr.f32.mxu0 %v1676_v28  ;;  %2279 = vmatpush3.msra.mxu0 %v1614_v23  ;;  %v1652_v23 = vld [vmem:[%s3631_s1 + $0x478] sm:$0xff]  ;;  %v1651_v28 = vld [vmem:[%s3631_s1 + $0x470] sm:$0xff] }
 0x9d6   :  { %1830 = vmatmul.mubr.f32.gmra.mxu0 %v1675_v35  ;;  %2280 = vmatprep.subr.mxu0 %v1629_v27  ;;  %v1636_v27 = vld [vmem:[%s3631_s1 + $0x3f8] sm:$0xff]  ;;  %v1650_v35 = vld [vmem:[%s3631_s1 + $0x468] sm:$0xff] }
 0x9d7   :  { %2281 = vmatpush3.msra.mxu0 %v1613_v31  ;;  %v1635_v31 = vld [vmem:[%s3631_s1 + $0x3f0] sm:$0xff] }
 0x9d8   :  { %v1481_v58 = vpop.permute.xlu1 %1480  ;;  %2282 = vmatprep.subr.mxu0 %v1628_v12  ;;  %v1634_v12 = vld [vmem:[%s3631_s1 + $0x3e8] sm:$0xff] }
 0x9d9   :  { %1486 = vst.msk [vmem:[#allocation4 + $0x20] sm:$0xff] %vm532_vm2, %v1481_v58  ;;  %2283 = vmatpush3.msra.mxu0 %v1612_v16  ;;  %v1649_v16 = vld [vmem:[%s3631_s1 + $0x460] sm:$0xff]  ;;  %v1648_v58 = vld [vmem:[%s3631_s1 + $0x458] sm:$0xff] }
 0x9da   :  { %2284 = vmatprep.subr.mxu0 %v1627_v33  ;;  %v1633_v33 = vld [vmem:[%s3631_s1 + $0x3e0] sm:$0xff] }
 0x9db   :  { %2285 = vmatpush3.msra.mxu0 %v1611_v36  ;;  %v1632_v36 = vld [vmem:[%s3631_s1 + $0x3d8] sm:$0xff] }
 0x9dc   :  { %v1483_v3 = vpop.permute.xlu1 %1482  ;;  %2286 = vmatprep.subr.mxu0 %v1626_v37 }
 0x9dd   :  { %1487 = vst.msk [vmem:[#allocation4 + $0x60] sm:$0xff] %vm532_vm2, %v1483_v3  ;;  %2287 = vmatpush3.msra.mxu0 %v1610_v39 }
 0x9de   :  { %2288 = vmatprep.subr.mxu0 %v1625_v41 }
 0x9df   :  { %2289 = vmatpush3.msra.mxu0 %v1609_v42 }
 0x9e0   :  { %2290 = vmatprep.subr.mxu0 %v1624_v32  ;;  %v1669_v5 = vld [vmem:[#allocation4 + $0x20] sm:$0xff] }
 0x9e1   :  { %2291 = vmatpush3.msra.mxu0 %v1608_v34  ;;  %v1988_v34 = vld [vmem:[%s3631_s1 + $0x4e8] sm:$0x1] }
 0x9e2   :  { %2292 = vmatprep.subr.mxu0 %v1623_v38  ;;  %v2447_v38 = vmov 0  }
 0x9e3   :  { %2293 = vmatpush3.msra.mxu0 %v1607_v40  ;;  %2417 = vset.pattern.permute.xlu0 %v2447_v38 }
 0x9e4   :  { %2294 = vmatprep.subr.mxu0 %v1622_v44  ;;  %v1677_v30 = vld [vmem:[#allocation4 + $0x60] sm:$0xff]  ;;  %2070 = vperm.xlu0 %2417, %v1988_v34  }
 0x9e5   :  { %2295 = vmatpush3.msra.mxu0 %v1606_v43 }
 0x9e6   :  { %2296 = vmatprep.subr.mxu0 %v1621_v46 }
 0x9e7   :  { %2297 = vmatpush3.msra.mxu0 %v1605_v45 }
 0x9e8   :  { %2298 = vmatprep.subr.mxu0 %v1620_v52  ;;  %v1497_v56 = vpop.permute.xlu0 %1496 }
 0x9e9   :  { %1502 = vst.msk [vmem:[#allocation4 + $0x28] sm:$0xff] %vm532_vm2, %v1497_v56  ;;  %2299 = vmatpush3.msra.mxu0 %v1604_v47 }
 0x9ea   :  { %2300 = vmatprep.subr.mxu0 %v1619_v48 }
 0x9eb   :  { %2301 = vmatpush3.msra.mxu0 %v1603_v50 }
 0x9ec   :  { %2302 = vmatprep.subr.mxu0 %v1618_v57  ;;  %v1499_v53 = vpop.permute.xlu0 %1498 }
 0x9ed   :  { %1503 = vst.msk [vmem:[#allocation4 + $0x68] sm:$0xff] %vm532_vm2, %v1499_v53  ;;  %2303 = vmatpush3.msra.mxu0 %v1602_v51 }
 0x9ee   :  { %2304 = vmatprep.subr.mxu0 %v1617_v0 }
 0x9ef   :  { %2305 = vmatpush3.msra.mxu0 %v1601_v55 }
 0x9f0   :  { %2306 = vmatprep.subr.mxu0 %v1616_v59  ;;  %v1670_v63 = vld [vmem:[#allocation4 + $0x28] sm:$0xff] }
 0x9f1   :  { %2307 = vmatpush3.msra.mxu0 %v1600_v61  ;;  %1899 = vmatprep.mubr.f32.mxu0 %v1670_v63  ;;  %v2162_v61 = vld [vmem:[%s3631_s1 + $0x4d8] ss:$0 sm:$0xff] }
 0x9f2   :  { %1900 = vmatmul.mubr.f32.vlgmr.msra.gmra.mxu0 %v1669_v5  ;;  %2314 = vmatprep.subr.mxu0 %v1663_v62 }
 0x9f3   :  { %2315 = vmatpush3.msra.mxu0 %v1647_v2 }
 0x9f4   :  { %v1678_v25 = vld [vmem:[#allocation4 + $0x68] sm:$0xff]  ;;  %2316 = vmatprep.subr.mxu0 %v1662_v6 }
 0x9f5   :  { %1904 = vmatprep.mubr.f32.mxu0 %v1678_v25  ;;  %2317 = vmatpush3.msra.mxu0 %v1646_v7 }
 0x9f6   :  { %1905 = vmatmul.mubr.f32.gmra.mxu0 %v1677_v30  ;;  %2318 = vmatprep.subr.mxu0 %v1661_v8 }
 0x9f7   :  { %2319 = vmatpush3.msra.mxu0 %v1645_v11 }
 0x9f8   :  { %v1513_v9 = vpop.permute.xlu1 %1512  ;;  %2320 = vmatprep.subr.mxu0 %v1660_v4 }
 0x9f9   :  { %1518 = vst.msk [vmem:[#allocation4 + $0x30] sm:$0xff] %vm532_vm2, %v1513_v9  ;;  %2321 = vmatpush3.msra.mxu0 %v1644_v13 }
 0x9fa   :  { %2322 = vmatprep.subr.mxu0 %v1659_v1 }
 0x9fb   :  { %2323 = vmatpush3.msra.mxu0 %v1643_v54 }
 0x9fc   :  { %v1515_v60 = vpop.permute.xlu1 %1514  ;;  %2324 = vmatprep.subr.mxu0 %v1658_v17 }
 0x9fd   :  { %1519 = vst.msk [vmem:[#allocation4 + $0x70] sm:$0xff] %vm532_vm2, %v1515_v60  ;;  %2325 = vmatpush3.msra.mxu0 %v1642_v20  ;;  %v1987_v60 = vld [vmem:[%s3631_s1 + $0x4e0] sm:$0xff]  ;;  %s2426_s1 = scalar_lea.vmem %s2089_s0, 32 }
 0x9fe   :  { %2326 = vmatprep.subr.mxu0 %v1657_v10  ;;  %p2428_p2 = scmp.lt.s32.totalorder %s2426_s1, %s2422_s22 }
 0x9ff   :  { %2327 = vmatpush3.msra.mxu0 %v1641_v21 }
 0xa00   :  { %2328 = vmatprep.subr.mxu0 %v1656_v14  ;;  %v1671_v3 = vld [vmem:[#allocation4 + $0x30] sm:$0xff]  ;;  %p2429_p3 = por %p2428_p2, %p2427_p1 }
 0xa01   :  { %2329 = vmatpush3.msra.mxu0 %v1640_v26 }
 0xa02   :  { %2330 = vmatprep.subr.mxu0 %v1655_v29  ;;  %p2430_p4 = pnand %p2429_p3, %p2423_p0 }
 0xa03   :  { %2331 = vmatpush3.msra.mxu0 %v1639_v15 }
 0xa04   :  { %2332 = vmatprep.subr.mxu0 %v1654_v49  ;;  %v1679_v32 = vld [vmem:[#allocation4 + $0x70] sm:$0xff] }
 0xa05   :  { %2333 = vmatpush3.msra.mxu0 %v1638_v18 }
 0xa06   :  { %2334 = vmatprep.subr.mxu0 %v1653_v19 }
 0xa07   :  { %2335 = vmatpush3.msra.mxu0 %v1637_v22 }
 0xa08   :  { %2336 = vmatprep.subr.mxu0 %v1652_v23 }
 0xa09   :  { %2337 = vmatpush3.msra.mxu0 %v1636_v27 }
 0xa0a   :  { %2338 = vmatprep.subr.mxu0 %v1651_v28 }
 0xa0b   :  { %2339 = vmatpush3.msra.mxu0 %v1635_v31 }
 0xa0c   :  { %2340 = vmatprep.subr.mxu0 %v1650_v35 }
 0xa0d   :  { %2341 = vmatpush3.msra.mxu0 %v1634_v12 }
 0xa0e   :  { %2342 = vmatprep.subr.mxu0 %v1649_v16 }
 0xa0f   :  { %2343 = vmatpush3.msra.mxu0 %v1633_v33 }
 0xa10   :  { %2344 = vmatprep.subr.mxu0 %v1648_v58 }
 0xa11   :  { %2345 = vmatpush3.msra.mxu0 %v1632_v36 }
 0xa12   :  { %2405 = vmatprep.subr.mxu0 %v2444_v24 }
 0xa28   :  { %v2232_v40 = vpop.f32.mrf.mxu0 }
 0xa2a   :  { %v2233_v44 = vpop.f32.mrf.mxu0 }
 0xa2b   :  { %v2234_v55 = vadd.f32 %v2233_v44, %v2232_v40 }
 0xa2c   :  { %v2235_v43 = vpop.f32.mrf.mxu0 }
 0xa2d   :  { %v1752_v7 = vadd.f32 %v2234_v55, %v2162_v61 }
 0xa2e   :  { %v2236_v46 = vpop.f32.mrf.mxu0 }
 0xa2f   :  { %v2237_v0 = vadd.f32 %v2236_v46, %v2235_v43 }
 0xa31   :  { %v1757_v63 = vadd.f32 %v2237_v0, %v2162_v61 }
 0xa40   :  { %v1529_v37 = vpop.permute.xlu0 %1528 }
 0xa41   :  { %1534 = vst.msk [vmem:[#allocation4 + $0x38] sm:$0xff] %vm532_vm2, %v1529_v37 }
 0xa44   :  { %v1531_v39 = vpop.permute.xlu0 %1530 }
 0xa45   :  { %1535 = vst.msk [vmem:[#allocation4 + $0x78] sm:$0xff] %vm532_vm2, %v1531_v39 }
 0xa48   :  { %v1672_v41 = vld [vmem:[#allocation4 + $0x38] sm:$0xff] }
 0xa49   :  { %1974 = vmatprep.mubr.f32.mxu0 %v1672_v41 }
 0xa4a   :  { %1975 = vmatmul.mubr.f32.vlgmr.msra.gmra.mxu0 %v1671_v3 }
 0xa4c   :  { %v1680_v42 = vld [vmem:[#allocation4 + $0x78] sm:$0xff] }
 0xa4d   :  { %1979 = vmatprep.mubr.f32.mxu0 %v1680_v42 }
 0xa4e   :  { %1980 = vmatmul.mubr.f32.gmra.mxu0 %v1679_v32 }
 0xa4f   :  { %2409 = vmatprep.mubr.msk.f32.mxu0 %vm2446_vm3, %v2444_v24 }
 0xa5f   :  { %v2071_v21 = vpop.permute.xlu0 %2070 }
 0xa92   :  { %v2270_v45 = vpop.f32.mrf.mxu0 }
 0xa94   :  { %v2271_v52 = vpop.f32.mrf.mxu0 }
 0xa95   :  { %v2272_v2 = vadd.f32 %v2271_v52, %v2270_v45 }
 0xa96   :  { %v2273_v47 = vpop.f32.mrf.mxu0 }
 0xa97   :  { %v1827_v30 = vadd.f32 %v2272_v2, %v1752_v7 }
 0xa98   :  { %v2274_v48 = vpop.f32.mrf.mxu0 }
 0xa99   :  { %v2275_v59 = vadd.f32 %v2274_v48, %v2273_v47 }
 0xa9b   :  { %v1832_v8 = vadd.f32 %v2275_v59, %v1757_v63 }
 0xab2   :  { %v2308_v56 = vpop.f32.mrf.mxu0 }
 0xab4   :  { %v2309_v50 = vpop.f32.mrf.mxu0 }
 0xab5   :  { %v2310_v25 = vadd.f32 %v2309_v50, %v2308_v56 }
 0xab6   :  { %v2311_v57 = vpop.f32.mrf.mxu0 }
 0xab7   :  { %v1902_v9 = vadd.f32 %v2310_v25, %v1827_v30 }
 0xab8   :  { %v2312_v51 = vpop.f32.mrf.mxu0 }
 0xab9   :  { %v2313_v5 = vadd.f32 %v2312_v51, %v2311_v57 }
 0xabb   :  { %v1907_v4 = vadd.f32 %v2313_v5, %v1832_v8 }
 0xb0a   :  { %v2346_v53 = vpop.f32.mrf.mxu0 }
 0xb0c   :  { %v2347_v62 = vpop.f32.mrf.mxu0 }
 0xb0d   :  { %v2348_v13 = vadd.f32 %v2347_v62, %v2346_v53 }
 0xb0e   :  { %v2349_v6 = vpop.f32.mrf.mxu0 }
 0xb0f   :  { %v1977_v17 = vadd.f32 %v2348_v13, %v1902_v9 }
 0xb10   :  { %v2350_v11 = vpop.f32.mrf.mxu0 }
 0xb11   :  { %v2351_v1 = vadd.f32 %v2350_v11, %v2349_v6  ;;  %v1985_v10 = vmax.f32 %v1977_v17, 0.0 }
 0xb13   :  { %v1982_v54 = vadd.f32 %v2351_v1, %v1907_v4 }
 0xb15   :  { %v1986_v20 = vmax.f32 %v1982_v54, 0.0 }
 0xb17   :  { %2406 = vmatpush3.xpose.msk.msra.mxu0 %vm565_vm1, %v1986_v20 }
 0xb18   :  { %2407 = vmatprep.subr.mxu0 %v2444_v24 }
 0xb1b   :  { %2408 = vmatpush3.xpose.msk.msra.mxu0 %vm565_vm1, %v1985_v10 }
 0xb1e   :  { %2410 = vmatmul.mubr.msk.f32.vlgmr.msra.gmra.mxu0 %vm565_vm1, %v1987_v60 }
 0xbde   :  { %v2064_v14 = vpop.f32.mrf.mxu0 }
 0xbdf   :  { %v2073_v26 = vadd.f32 %v2071_v21, %v2064_v14 }
 0xbe0   :  { %v2411_v29 = vpop.f32.mrf.mxu0 }
 0xbe1   :  { %v2166_v15 = vmul.f32 -1.442695, %v2073_v26 }
 0xbe3   :  { %2418 = vpow2.f32 %v2166_v15 }
 0xbf0   :  { %v2419_v49 = vpop.eup %2418 }
 0xbf1   :  { %v2077_v18 = vadd.f32 1.0, %v2419_v49 }
 0xbf3   :  { %2420 = vrcp.f32 %v2077_v18 }
 0xc00   :  { %v2421_v24 = vpop.eup %2420 }
 0xc01   :  { %2081 = vst.msk [vmem:[#allocation5] sm:$0x1] %vm2080_vm4, %v2421_v24 }
 0xc02   :  { %2433 = shalt.err (!%p2430_p4)
}
 0xc03   :  { %2091 = dma.vmem_to_hbm [thread:$0]  %s2089_s0, 16, %s3632_s2, [#allocation6]  }
 0xc04   :  { %2442 = dma.done.wait [#allocation6], 16  }
 0xc05   :  { %2443 = vsyncadd [#allocation6], 4294967280 }
 0xc06   :  { %2095 = vsyncpa [#allocation6], 1 }

</bundles_post_ra>
